<compile_context>
chip_gen: v7x
topology: tpu7x:2x2x1
jax: 0.10.0
libtpu: 0.0.40
codegen_flags: <defaults>
</compile_context>

<pallas_src>
import functools

import jax
import jax.numpy as jnp
import numpy as np
from jax.experimental import pallas as pl
from jax.experimental.pallas import tpu as pltpu


def _round_up(x, m):
    return (x + m - 1) // m * m


# ---------------------------------------------------------------------------
# Kernel
# ---------------------------------------------------------------------------
def _encoding_kernel(x_ref, *refs, D, K1, stacked, compute_dtype, recip_approx):
    f32 = jnp.float32
    dot = functools.partial(jnp.dot, preferred_element_type=f32)

    o_ref = refs[-1]
    x = x_ref[0]                                   # (D, TN) f32
    xc = x.astype(compute_dtype)

    if stacked:
        wa_ref, b1_ref, wb_ref, b2_ref, p3_ref, c1g_ref = refs[:-1]
        # One MXU push per stage; rows 0:D = conv pre-activation, rows D: = z part.
        r1 = dot(wa_ref[...], xc)                  # (D+K1, TN)
        x2 = jnp.maximum(r1[:D] + b1_ref[...], 0.0)
        x2c = x2.astype(compute_dtype)
        r2 = dot(wb_ref[...], x2c)                 # (D+K1, TN)
        x3 = jnp.maximum(r2[:D] + b2_ref[...], 0.0)
        x3c = x3.astype(compute_dtype)
        z = r1[D:] + r2[D:] + dot(p3_ref[...], x3c)            # (K1, TN)
    else:
        (w1_ref, b1_ref, w2_ref, b2_ref,
         p1_ref, p2_ref, p3_ref, c1g_ref) = refs[:-1]
        x2 = jnp.maximum(dot(w1_ref[...], xc) + b1_ref[...], 0.0)
        x2c = x2.astype(compute_dtype)
        x3 = jnp.maximum(dot(w2_ref[...], x2c) + b2_ref[...], 0.0)
        x3c = x3.astype(compute_dtype)
        z = (dot(p1_ref[...], xc) + dot(p2_ref[...], x2c)
             + dot(p3_ref[...], x3c))                           # (K1, TN)

    # Per-pixel softmax over the codeword axis K1 (dim=-2 of (B, K1, N)).
    z = z - jnp.max(z, axis=0, keepdims=True)
    e = jnp.exp(z)
    t = e * pl.reciprocal(jnp.sum(e, axis=0, keepdims=True), approx=recip_approx)

    # E = X + gamma1 * codewords1 @ t   (gamma1 folded into C1g).
    o_ref[0] = x + dot(c1g_ref[...], t.astype(compute_dtype))


# ---------------------------------------------------------------------------
# Tile / VMEM sizing helpers (generation-aware)
# ---------------------------------------------------------------------------
def _vmem_budget_bytes():
    cap = None
    try:
        cap = getattr(pltpu.get_tpu_info(), "vmem_capacity_bytes", None)
    except Exception:
        cap = None
    if not cap:
        cap = 64 * 1024 * 1024          # conservative default (v7x per-core VMEM)
    return int(cap * 0.70)              # leave headroom for compiler scratch


def _vmem_estimate_bytes(D, K1, TN, mm_bytes):
    f32b = 4
    io = 2 * 2 * D * TN * f32b                       # double-buffered X + E tiles
    consts = 2 * (2 * (D + K1) * D * mm_bytes        # WA, WB (assume 2 buffers)
                  + 2 * K1 * D * mm_bytes            # P3, C1g
                  + 2 * D * 128 * f32b)              # biases (lane-padded)
    inter = (6 * D + 4 * K1) * TN * f32b             # x2/x3/z/e/t + bf16 casts
    return io + consts + inter


def _choose_tile_n(N128, B, D, K1, mm_bytes, tile_cap, vmem_budget):
    cands = [t for t in range(128, N128 + 128, 128) if N128 % t == 0]
    tn = 128
    for t in cands:
        if t <= tile_cap and _vmem_estimate_bytes(D, K1, t, mm_bytes) <= vmem_budget:
            tn = t
    # v7x megacore: keep at least 2 grid steps when the spatial axis allows it.
    if B * (N128 // tn) < 2:
        smaller = [t for t in cands if t < tn and B * (N128 // t) >= 2]
        if smaller:
            tn = smaller[-1]
    return tn


# ---------------------------------------------------------------------------
# Wrapper
# ---------------------------------------------------------------------------
def pydict_encoding_forward(x_nchw, params, *, tile_n=2048,
                            matmul_dtype=jnp.bfloat16, recip_approx=None):
    """x_nchw: (B, D, h, w) float32.  Returns (B, D, h, w) float32."""
    B, D, h, w = x_nchw.shape
    N = h * w
    (w1, b1, w2, b2, c1, c2, c3, s1, s2, s3, gammas) = params
    K1 = c1.shape[1]
    f32 = jnp.float32
    md = matmul_dtype
    if recip_approx is None:
        recip_approx = (md != f32)      # exact reciprocal on the f32 path

    # ---- Hoisted, batch-invariant parameter math (done once, outside the grid).
    g1, g2, g3 = gammas[0], gammas[1], gammas[2]
    scT1 = (c1 * s1).T                                   # (K1, D)
    scT2 = (c2 * s2).T                                   # (K2, D)
    scT3 = (c3 * s3).T                                   # (K3, D)
    S2 = jax.nn.softmax(c1.T @ c2, axis=-1)              # (K1, K2)
    S3 = jax.nn.softmax(c2.T @ c3, axis=-1)              # (K2, K3)
    P1 = scT1                                            # (K1, D)
    P2 = g2 * (S2 @ scT2)                                # (K1, D)
    P3 = ((g2 * g3) * (S2 @ (S3 @ scT3))).astype(md)     # (K1, D)
    C1g = (g1 * c1).astype(md)                           # (D, K1)
    b1 = b1.astype(f32)
    b2 = b2.astype(f32)

    # Stack the K1-row projections onto the DxD conv weights (one MXU push per
    # stage); requires the row split to stay on an 8-sublane boundary.
    stacked = (D % 8 == 0) and (K1 % 8 == 0)
    if stacked:
        WA = jnp.concatenate([w1, P1], axis=0).astype(md)    # (D+K1, D)
        WB = jnp.concatenate([w2, P2], axis=0).astype(md)    # (D+K1, D)
        const_ops = (WA, b1, WB, b2, P3, C1g)
    else:
        const_ops = (w1.astype(md), b1, w2.astype(md), b2,
                     P1.astype(md), P2.astype(md), P3, C1g)

    # ---- Spatial tiling: pad N only to the next multiple of 128 and pick a
    #      lane-dense TN that divides it and fits the VMEM budget.
    mm_bytes = jnp.dtype(md).itemsize
    vmem_budget = _vmem_budget_bytes()
    N128 = _round_up(N, 128)
    TN = _choose_tile_n(N128, B, D, K1, mm_bytes, tile_n, vmem_budget)

    x = x_nchw.reshape(B, D, N).astype(f32)
    if N128 != N:
        x = jnp.pad(x, ((0, 0), (0, 0), (0, N128 - N)))

    grid = (B, N128 // TN)
    kernel = functools.partial(_encoding_kernel, D=D, K1=K1, stacked=stacked,
                               compute_dtype=md, recip_approx=recip_approx)

    def call(single_buffer_consts):
        const_kw = ({"pipeline_mode": pl.Buffered(1)}
                    if single_buffer_consts else {})

        def const_spec(arr):
            return pl.BlockSpec(arr.shape, lambda b, n: (0, 0), **const_kw)

        tile_spec = pl.BlockSpec((1, D, TN), lambda b, n: (b, 0, n))
        return pl.pallas_call(
            kernel,
            out_shape=jax.ShapeDtypeStruct((B, D, N128), f32),
            grid=grid,
            in_specs=[tile_spec] + [const_spec(a) for a in const_ops],
            out_specs=tile_spec,
            # X tile and E tile of a given grid step are disjoint in HBM from
            # every other step's tiles, so in-place update is safe.
            input_output_aliases={0: 0},
            compiler_params=pltpu.CompilerParams(
                dimension_semantics=("parallel", "parallel"),
                vmem_limit_bytes=vmem_budget),
        )(x, *const_ops)

    try:
        out = call(True)        # single-buffered constant operands
    except Exception:
        out = call(False)       # fall back to default double-buffering

    if N128 != N:
        out = out[:, :, :N]
    return out.reshape(B, D, h, w)


# ---------------------------------------------------------------------------
# Parameter construction / reference (BatchNorm assumed in eval mode)
# ---------------------------------------------------------------------------
def _fold_conv_bn(conv_w, bn_gamma, bn_beta, bn_mean, bn_var, eps=1e-5):
    """Fold 1x1 Conv2d(D->D, bias=False) + BatchNorm2d(eval) into W_eff, b_eff."""
    inv_std = 1.0 / jnp.sqrt(bn_var + eps)
    scale = bn_gamma * inv_std                       # (D,)
    w_eff = scale[:, None] * conv_w                  # (D, D)
    b_eff = (bn_beta - bn_mean * scale)[:, None]     # (D, 1)
    return w_eff.astype(jnp.float32), b_eff.astype(jnp.float32)


def make_params(key, D, K1, K2, K3):
    ks = jax.random.split(key, 12)
    std1 = 1.0 / np.sqrt(K1 * D)
    std2 = 1.0 / np.sqrt(K2 * D)
    std3 = 1.0 / np.sqrt(K3 * D)
    c1 = jax.random.uniform(ks[0], (D, K1), jnp.float32, -std1, std1)
    c2 = jax.random.uniform(ks[1], (D, K2), jnp.float32, -std2, std2)
    c3 = jax.random.uniform(ks[2], (D, K3), jnp.float32, -std3, std3)
    s1 = jax.random.uniform(ks[3], (1, K1), jnp.float32, -1.0, 0.0)
    s2 = jax.random.uniform(ks[4], (1, K2), jnp.float32, -1.0, 0.0)
    s3 = jax.random.uniform(ks[5], (1, K3), jnp.float32, -1.0, 0.0)

    # 1x1 conv weights (D_out, D_in) + BatchNorm2d(eval) stats, folded.
    cw = 1.0 / np.sqrt(D)
    conv1_w = jax.random.uniform(ks[6], (D, D), jnp.float32, -cw, cw)
    conv2_w = jax.random.uniform(ks[7], (D, D), jnp.float32, -cw, cw)
    bn1_g = jax.random.uniform(ks[8], (D,), jnp.float32, 0.5, 1.5)
    bn1_b = jax.random.uniform(ks[9], (D,), jnp.float32, -0.1, 0.1)
    bn1_m = jnp.zeros((D,), jnp.float32)
    bn1_v = jnp.ones((D,), jnp.float32)
    bn2_g = jax.random.uniform(ks[10], (D,), jnp.float32, 0.5, 1.5)
    bn2_b = jax.random.uniform(ks[11], (D,), jnp.float32, -0.1, 0.1)
    bn2_m = jnp.zeros((D,), jnp.float32)
    bn2_v = jnp.ones((D,), jnp.float32)
    w1, b1 = _fold_conv_bn(conv1_w, bn1_g, bn1_b, bn1_m, bn1_v)
    w2, b2 = _fold_conv_bn(conv2_w, bn2_g, bn2_b, bn2_m, bn2_v)

    # PyTorch inits gamma1/2/3 to zero (which makes E == X); use nonzero values
    # here so the full encoding path is actually exercised / checked.
    gammas = jnp.array([0.5, 0.3, 0.2], jnp.float32)
    return (w1, b1, w2, b2, c1, c2, c3, s1, s2, s3, gammas)


def reference_forward(x_nchw, params):
    """Pure-JAX reference matching the PyTorch module (BN in eval mode)."""
    (w1, b1, w2, b2, c1, c2, c3, s1, s2, s3, gammas) = params
    B, D, h, w = x_nchw.shape
    N = h * w
    x = x_nchw.reshape(B, D, N).astype(jnp.float32)
    x2 = jnp.maximum(jnp.einsum("cd,bdn->bcn", w1, x) + b1[None], 0.0)
    x3 = jnp.maximum(jnp.einsum("cd,bdn->bcn", w2, x2) + b2[None], 0.0)
    a1 = jnp.einsum("dk,bdn->bkn", c1 * s1, x)
    a2 = jnp.einsum("dk,bdn->bkn", c2 * s2, x2)
    a3 = jnp.einsum("dk,bdn->bkn", c3 * s3, x3)
    S2 = jax.nn.softmax(c1.T @ c2, axis=-1)
    S3 = jax.nn.softmax(c2.T @ c3, axis=-1)
    g1, g2, g3 = gammas[0], gammas[1], gammas[2]
    sa3 = jnp.einsum("kj,bjn->bkn", S3, a3)
    sa2 = jnp.einsum("kj,bjn->bkn", S2, a2 + g3 * sa3)
    t = jax.nn.softmax(a1 + g2 * sa2, axis=-2)
    sa1 = jnp.einsum("dk,bkn->bdn", c1, t)
    return (x + g1 * sa1).reshape(B, D, h, w)


if __name__ == "__main__":
    B, D, h, w = 2, 16, 16, 16
    K1, K2, K3 = 32, 16, 8

    key = jax.random.PRNGKey(0)
    k_x, k_p = jax.random.split(key)
    x = jax.random.normal(k_x, (B, D, h, w), jnp.float32)
    params = make_params(k_p, D, K1, K2, K3)

    ref = reference_forward(x, params)

    # f32 MXU-operand path: tight-tolerance validation of the kernel math.
    out_f32 = jax.block_until_ready(
        pydict_encoding_forward(x, params, matmul_dtype=jnp.float32))
    np.testing.assert_allclose(np.asarray(out_f32), np.asarray(ref),
                               rtol=1e-4, atol=2e-5)

    # Default path: bf16 MXU operands (f32 accumulation / softmax / residual).
    out_bf16 = jax.block_until_ready(pydict_encoding_forward(x, params))
    np.testing.assert_allclose(np.asarray(out_bf16), np.asarray(ref),
                               rtol=2e-2, atol=2e-2)

    print("KERNEL_OK")
</pallas_src>

<mosaic_0001>
module attributes {stable_mosaic.version = 11 : i64} {
  func.func @_encoding_kernel(%arg0: i32, %arg1: i32, %arg2: memref<1x16x256xf32, #tpu.memory_space<vmem>>, %arg3: memref<48x16xf32, #tpu.memory_space<vmem>>, %arg4: memref<16x1xf32, #tpu.memory_space<vmem>>, %arg5: memref<48x16xf32, #tpu.memory_space<vmem>>, %arg6: memref<16x1xf32, #tpu.memory_space<vmem>>, %arg7: memref<32x16xf32, #tpu.memory_space<vmem>>, %arg8: memref<16x32xf32, #tpu.memory_space<vmem>>, %arg9: memref<1x16x256xf32, #tpu.memory_space<vmem>>) attributes {dimension_semantics = [#tpu.dimension_semantics<parallel>, #tpu.dimension_semantics<parallel>], iteration_bounds = array<i64: 2, 1>, scalar_prefetch = 0 : i64, scratch_operands = 0 : i64, tpu.core_type = #tpu.core_type<tc>, window_params = [{transform_indices = @transform_0, window_bounds = array<i64: 1, 16, 256>}, {pipeline_mode = #tpu.pipeline_mode<synchronous>, transform_indices = @transform_1, window_bounds = array<i64: 48, 16>}, {pipeline_mode = #tpu.pipeline_mode<synchronous>, transform_indices = @transform_2, window_bounds = array<i64: 16, 1>}, {pipeline_mode = #tpu.pipeline_mode<synchronous>, transform_indices = @transform_3, window_bounds = array<i64: 48, 16>}, {pipeline_mode = #tpu.pipeline_mode<synchronous>, transform_indices = @transform_4, window_bounds = array<i64: 16, 1>}, {pipeline_mode = #tpu.pipeline_mode<synchronous>, transform_indices = @transform_5, window_bounds = array<i64: 32, 16>}, {pipeline_mode = #tpu.pipeline_mode<synchronous>, transform_indices = @transform_6, window_bounds = array<i64: 16, 32>}, {transform_indices = @transform_7, window_bounds = array<i64: 1, 16, 256>}]} {
    %c0 = arith.constant 0 : index
    %c0_0 = arith.constant 0 : index
    %c0_1 = arith.constant 0 : index
    %0 = vector.load %arg2[%c0, %c0_0, %c0_1] : memref<1x16x256xf32, #tpu.memory_space<vmem>>, vector<1x16x256xf32>
    %1 = vector.shape_cast %0 : vector<1x16x256xf32> to vector<16x256xf32>
    %c0_2 = arith.constant 0 : index
    %c0_3 = arith.constant 0 : index
    %2 = vector.load %arg3[%c0_2, %c0_3] : memref<48x16xf32, #tpu.memory_space<vmem>>, vector<48x16xf32>
    %cst = arith.constant dense<0.000000e+00> : vector<48x256xf32>
    %3 = tpu.matmul %2, %1, %cst {dimension_numbers = #tpu.dot_dimension_numbers<[1], [0], [0], [1], [0, 0, 1, 1], [], []>} : vector<48x16xf32>, vector<16x256xf32>, vector<48x256xf32> -> vector<48x256xf32>
    %4 = vector.extract_strided_slice %3 {offsets = [0, 0], sizes = [16, 256], strides = [1, 1]} : vector<48x256xf32> to vector<16x256xf32>
    %c0_4 = arith.constant 0 : index
    %c0_5 = arith.constant 0 : index
    %5 = vector.load %arg4[%c0_4, %c0_5] : memref<16x1xf32, #tpu.memory_space<vmem>>, vector<16x1xf32>
    %6 = vector.broadcast %5 : vector<16x1xf32> to vector<16x256xf32>
    %7 = arith.addf %4, %6 : vector<16x256xf32>
    %cst_6 = arith.constant 0.000000e+00 : f32
    %8 = vector.broadcast %cst_6 : f32 to vector<16x256xf32>
    %9 = arith.maximumf %7, %8 : vector<16x256xf32>
    %c0_7 = arith.constant 0 : index
    %c0_8 = arith.constant 0 : index
    %10 = vector.load %arg5[%c0_7, %c0_8] : memref<48x16xf32, #tpu.memory_space<vmem>>, vector<48x16xf32>
    %cst_9 = arith.constant dense<0.000000e+00> : vector<48x256xf32>
    %11 = tpu.matmul %10, %9, %cst_9 {dimension_numbers = #tpu.dot_dimension_numbers<[1], [0], [0], [1], [0, 0, 1, 1], [], []>} : vector<48x16xf32>, vector<16x256xf32>, vector<48x256xf32> -> vector<48x256xf32>
    %12 = vector.extract_strided_slice %11 {offsets = [0, 0], sizes = [16, 256], strides = [1, 1]} : vector<48x256xf32> to vector<16x256xf32>
    %c0_10 = arith.constant 0 : index
    %c0_11 = arith.constant 0 : index
    %13 = vector.load %arg6[%c0_10, %c0_11] : memref<16x1xf32, #tpu.memory_space<vmem>>, vector<16x1xf32>
    %14 = vector.broadcast %13 : vector<16x1xf32> to vector<16x256xf32>
    %15 = arith.addf %12, %14 : vector<16x256xf32>
    %cst_12 = arith.constant 0.000000e+00 : f32
    %16 = vector.broadcast %cst_12 : f32 to vector<16x256xf32>
    %17 = arith.maximumf %15, %16 : vector<16x256xf32>
    %18 = vector.extract_strided_slice %3 {offsets = [16, 0], sizes = [32, 256], strides = [1, 1]} : vector<48x256xf32> to vector<32x256xf32>
    %19 = vector.extract_strided_slice %11 {offsets = [16, 0], sizes = [32, 256], strides = [1, 1]} : vector<48x256xf32> to vector<32x256xf32>
    %20 = arith.addf %18, %19 : vector<32x256xf32>
    %c0_13 = arith.constant 0 : index
    %c0_14 = arith.constant 0 : index
    %21 = vector.load %arg7[%c0_13, %c0_14] : memref<32x16xf32, #tpu.memory_space<vmem>>, vector<32x16xf32>
    %cst_15 = arith.constant dense<0.000000e+00> : vector<32x256xf32>
    %22 = tpu.matmul %21, %17, %cst_15 {dimension_numbers = #tpu.dot_dimension_numbers<[1], [0], [0], [1], [0, 0, 1, 1], [], []>} : vector<32x16xf32>, vector<16x256xf32>, vector<32x256xf32> -> vector<32x256xf32>
    %23 = arith.addf %20, %22 : vector<32x256xf32>
    %cst_16 = arith.constant dense<0xFF800000> : vector<256xf32>
    %24 = vector.multi_reduction <maximumf>, %23, %cst_16 [0] : vector<32x256xf32> to vector<256xf32>
    %25 = vector.shape_cast %24 : vector<256xf32> to vector<1x256xf32>
    %26 = vector.broadcast %25 : vector<1x256xf32> to vector<32x256xf32>
    %27 = arith.subf %23, %26 : vector<32x256xf32>
    %28 = math.exp %27 : vector<32x256xf32>
    %cst_17 = arith.constant dense<0.000000e+00> : vector<256xf32>
    %29 = vector.multi_reduction <add>, %28, %cst_17 [0] : vector<32x256xf32> to vector<256xf32>
    %30 = vector.shape_cast %29 : vector<256xf32> to vector<1x256xf32>
    %31 = tpu.reciprocal %30 : vector<1x256xf32> -> vector<1x256xf32>
    %32 = vector.broadcast %31 : vector<1x256xf32> to vector<32x256xf32>
    %33 = arith.mulf %28, %32 : vector<32x256xf32>
    %c0_18 = arith.constant 0 : index
    %c0_19 = arith.constant 0 : index
    %34 = vector.load %arg8[%c0_18, %c0_19] : memref<16x32xf32, #tpu.memory_space<vmem>>, vector<16x32xf32>
    %cst_20 = arith.constant dense<0.000000e+00> : vector<16x256xf32>
    %35 = tpu.matmul %34, %33, %cst_20 {dimension_numbers = #tpu.dot_dimension_numbers<[1], [0], [0], [1], [0, 0, 1, 1], [], []>} : vector<16x32xf32>, vector<32x256xf32>, vector<16x256xf32> -> vector<16x256xf32>
    %36 = arith.addf %1, %35 : vector<16x256xf32>
    %c0_21 = arith.constant 0 : index
    %c0_22 = arith.constant 0 : index
    %c0_23 = arith.constant 0 : index
    %37 = vector.load %arg9[%c0_21, %c0_22, %c0_23] : memref<1x16x256xf32, #tpu.memory_space<vmem>>, vector<1x16x256xf32>
    %38 = vector.shape_cast %37 : vector<1x16x256xf32> to vector<16x256xf32>
    %39 = vector.shape_cast %36 : vector<16x256xf32> to vector<1x16x256xf32>
    tpu.vector_store %arg9[%c0_21, %c0_22, %c0_23], %39 {strides = array<i32>} : memref<1x16x256xf32, #tpu.memory_space<vmem>>, vector<1x16x256xf32>,
    return
  }
  func.func @transform_0(%arg0: i32, %arg1: i32) -> (i32, i32, i32) {
    %c0_i32 = arith.constant 0 : i32
    %c0_i32_0 = arith.constant 0 : i32
    return %arg0, %c0_i32, %arg1 : i32, i32, i32
  }
  func.func @transform_1(%arg0: i32, %arg1: i32) -> (i32, i32) {
    %c0_i32 = arith.constant 0 : i32
    %c0_i32_0 = arith.constant 0 : i32
    %c0_i32_1 = arith.constant 0 : i32
    return %c0_i32, %c0_i32_0 : i32, i32
  }
  func.func @transform_2(%arg0: i32, %arg1: i32) -> (i32, i32) {
    %c0_i32 = arith.constant 0 : i32
    %c0_i32_0 = arith.constant 0 : i32
    %c0_i32_1 = arith.constant 0 : i32
    return %c0_i32, %c0_i32_0 : i32, i32
  }
  func.func @transform_3(%arg0: i32, %arg1: i32) -> (i32, i32) {
    %c0_i32 = arith.constant 0 : i32
    %c0_i32_0 = arith.constant 0 : i32
    %c0_i32_1 = arith.constant 0 : i32
    return %c0_i32, %c0_i32_0 : i32, i32
  }
  func.func @transform_4(%arg0: i32, %arg1: i32) -> (i32, i32) {
    %c0_i32 = arith.constant 0 : i32
    %c0_i32_0 = arith.constant 0 : i32
    %c0_i32_1 = arith.constant 0 : i32
    return %c0_i32, %c0_i32_0 : i32, i32
  }
  func.func @transform_5(%arg0: i32, %arg1: i32) -> (i32, i32) {
    %c0_i32 = arith.constant 0 : i32
    %c0_i32_0 = arith.constant 0 : i32
    %c0_i32_1 = arith.constant 0 : i32
    return %c0_i32, %c0_i32_0 : i32, i32
  }
  func.func @transform_6(%arg0: i32, %arg1: i32) -> (i32, i32) {
    %c0_i32 = arith.constant 0 : i32
    %c0_i32_0 = arith.constant 0 : i32
    %c0_i32_1 = arith.constant 0 : i32
    return %c0_i32, %c0_i32_0 : i32, i32
  }
  func.func @transform_7(%arg0: i32, %arg1: i32) -> (i32, i32, i32) {
    %c0_i32 = arith.constant 0 : i32
    %c0_i32_0 = arith.constant 0 : i32
    return %arg0, %c0_i32, %arg1 : i32, i32, i32
  }
}

module attributes {stable_mosaic.version = 11 : i64} {
  func.func @_encoding_kernel(%arg0: i32, %arg1: i32, %arg2: memref<1x16x256xf32, #tpu.memory_space<vmem>>, %arg3: memref<48x16xf32, #tpu.memory_space<vmem>>, %arg4: memref<16x1xf32, #tpu.memory_space<vmem>>, %arg5: memref<48x16xf32, #tpu.memory_space<vmem>>, %arg6: memref<16x1xf32, #tpu.memory_space<vmem>>, %arg7: memref<32x16xf32, #tpu.memory_space<vmem>>, %arg8: memref<16x32xf32, #tpu.memory_space<vmem>>, %arg9: memref<1x16x256xf32, #tpu.memory_space<vmem>>) attributes {dimension_semantics = [#tpu.dimension_semantics<parallel>, #tpu.dimension_semantics<parallel>], iteration_bounds = array<i64: 2, 1>, scalar_prefetch = 0 : i64, scratch_operands = 0 : i64, tpu.core_type = #tpu.core_type<tc>, window_params = [{transform_indices = @transform_0, window_bounds = array<i64: 1, 16, 256>}, {pipeline_mode = #tpu.pipeline_mode<synchronous>, transform_indices = @transform_1, window_bounds = array<i64: 48, 16>}, {pipeline_mode = #tpu.pipeline_mode<synchronous>, transform_indices = @transform_2, window_bounds = array<i64: 16, 1>}, {pipeline_mode = #tpu.pipeline_mode<synchronous>, transform_indices = @transform_3, window_bounds = array<i64: 48, 16>}, {pipeline_mode = #tpu.pipeline_mode<synchronous>, transform_indices = @transform_4, window_bounds = array<i64: 16, 1>}, {pipeline_mode = #tpu.pipeline_mode<synchronous>, transform_indices = @transform_5, window_bounds = array<i64: 32, 16>}, {pipeline_mode = #tpu.pipeline_mode<synchronous>, transform_indices = @transform_6, window_bounds = array<i64: 16, 32>}, {transform_indices = @transform_7, window_bounds = array<i64: 1, 16, 256>}]} {
    %c0 = arith.constant 0 : index
    %c0_0 = arith.constant 0 : index
    %c0_1 = arith.constant 0 : index
    %0 = vector.load %arg2[%c0, %c0_0, %c0_1] : memref<1x16x256xf32, #tpu.memory_space<vmem>>, vector<1x16x256xf32>
    %1 = vector.shape_cast %0 : vector<1x16x256xf32> to vector<16x256xf32>
    %c0_2 = arith.constant 0 : index
    %c0_3 = arith.constant 0 : index
    %2 = vector.load %arg3[%c0_2, %c0_3] : memref<48x16xf32, #tpu.memory_space<vmem>>, vector<48x16xf32>
    %cst = arith.constant dense<0.000000e+00> : vector<48x256xf32>
    %3 = tpu.matmul %2, %1, %cst {dimension_numbers = #tpu.dot_dimension_numbers<[1], [0], [0], [1], [0, 0, 1, 1], [], []>} : vector<48x16xf32>, vector<16x256xf32>, vector<48x256xf32> -> vector<48x256xf32>
    %4 = vector.extract_strided_slice %3 {offsets = [0, 0], sizes = [16, 256], strides = [1, 1]} : vector<48x256xf32> to vector<16x256xf32>
    %c0_4 = arith.constant 0 : index
    %c0_5 = arith.constant 0 : index
    %5 = vector.load %arg4[%c0_4, %c0_5] : memref<16x1xf32, #tpu.memory_space<vmem>>, vector<16x1xf32>
    %6 = vector.broadcast %5 : vector<16x1xf32> to vector<16x256xf32>
    %7 = arith.addf %4, %6 : vector<16x256xf32>
    %cst_6 = arith.constant 0.000000e+00 : f32
    %8 = vector.broadcast %cst_6 : f32 to vector<16x256xf32>
    %9 = arith.maximumf %7, %8 : vector<16x256xf32>
    %c0_7 = arith.constant 0 : index
    %c0_8 = arith.constant 0 : index
    %10 = vector.load %arg5[%c0_7, %c0_8] : memref<48x16xf32, #tpu.memory_space<vmem>>, vector<48x16xf32>
    %cst_9 = arith.constant dense<0.000000e+00> : vector<48x256xf32>
    %11 = tpu.matmul %10, %9, %cst_9 {dimension_numbers = #tpu.dot_dimension_numbers<[1], [0], [0], [1], [0, 0, 1, 1], [], []>} : vector<48x16xf32>, vector<16x256xf32>, vector<48x256xf32> -> vector<48x256xf32>
    %12 = vector.extract_strided_slice %11 {offsets = [0, 0], sizes = [16, 256], strides = [1, 1]} : vector<48x256xf32> to vector<16x256xf32>
    %c0_10 = arith.constant 0 : index
    %c0_11 = arith.constant 0 : index
    %13 = vector.load %arg6[%c0_10, %c0_11] : memref<16x1xf32, #tpu.memory_space<vmem>>, vector<16x1xf32>
    %14 = vector.broadcast %13 : vector<16x1xf32> to vector<16x256xf32>
    %15 = arith.addf %12, %14 : vector<16x256xf32>
    %cst_12 = arith.constant 0.000000e+00 : f32
    %16 = vector.broadcast %cst_12 : f32 to vector<16x256xf32>
    %17 = arith.maximumf %15, %16 : vector<16x256xf32>
    %18 = vector.extract_strided_slice %3 {offsets = [16, 0], sizes = [32, 256], strides = [1, 1]} : vector<48x256xf32> to vector<32x256xf32>
    %19 = vector.extract_strided_slice %11 {offsets = [16, 0], sizes = [32, 256], strides = [1, 1]} : vector<48x256xf32> to vector<32x256xf32>
    %20 = arith.addf %18, %19 : vector<32x256xf32>
    %c0_13 = arith.constant 0 : index
    %c0_14 = arith.constant 0 : index
    %21 = vector.load %arg7[%c0_13, %c0_14] : memref<32x16xf32, #tpu.memory_space<vmem>>, vector<32x16xf32>
    %cst_15 = arith.constant dense<0.000000e+00> : vector<32x256xf32>
    %22 = tpu.matmul %21, %17, %cst_15 {dimension_numbers = #tpu.dot_dimension_numbers<[1], [0], [0], [1], [0, 0, 1, 1], [], []>} : vector<32x16xf32>, vector<16x256xf32>, vector<32x256xf32> -> vector<32x256xf32>
    %23 = arith.addf %20, %22 : vector<32x256xf32>
    %cst_16 = arith.constant dense<0xFF800000> : vector<256xf32>
    %24 = vector.multi_reduction <maximumf>, %23, %cst_16 [0] : vector<32x256xf32> to vector<256xf32>
    %25 = vector.shape_cast %24 : vector<256xf32> to vector<1x256xf32>
    %26 = vector.broadcast %25 : vector<1x256xf32> to vector<32x256xf32>
    %27 = arith.subf %23, %26 : vector<32x256xf32>
    %28 = math.exp %27 : vector<32x256xf32>
    %cst_17 = arith.constant dense<0.000000e+00> : vector<256xf32>
    %29 = vector.multi_reduction <add>, %28, %cst_17 [0] : vector<32x256xf32> to vector<256xf32>
    %30 = vector.shape_cast %29 : vector<256xf32> to vector<1x256xf32>
    %31 = tpu.reciprocal %30 : vector<1x256xf32> -> vector<1x256xf32>
    %32 = vector.broadcast %31 : vector<1x256xf32> to vector<32x256xf32>
    %33 = arith.mulf %28, %32 : vector<32x256xf32>
    %c0_18 = arith.constant 0 : index
    %c0_19 = arith.constant 0 : index
    %34 = vector.load %arg8[%c0_18, %c0_19] : memref<16x32xf32, #tpu.memory_space<vmem>>, vector<16x32xf32>
    %cst_20 = arith.constant dense<0.000000e+00> : vector<16x256xf32>
    %35 = tpu.matmul %34, %33, %cst_20 {dimension_numbers = #tpu.dot_dimension_numbers<[1], [0], [0], [1], [0, 0, 1, 1], [], []>} : vector<16x32xf32>, vector<32x256xf32>, vector<16x256xf32> -> vector<16x256xf32>
    %36 = arith.addf %1, %35 : vector<16x256xf32>
    %c0_21 = arith.constant 0 : index
    %c0_22 = arith.constant 0 : index
    %c0_23 = arith.constant 0 : index
    %37 = vector.load %arg9[%c0_21, %c0_22, %c0_23] : memref<1x16x256xf32, #tpu.memory_space<vmem>>, vector<1x16x256xf32>
    %38 = vector.shape_cast %37 : vector<1x16x256xf32> to vector<16x256xf32>
    %39 = vector.shape_cast %36 : vector<16x256xf32> to vector<1x16x256xf32>
    tpu.vector_store %arg9[%c0_21, %c0_22, %c0_23], %39 {strides = array<i32>} : memref<1x16x256xf32, #tpu.memory_space<vmem>>, vector<1x16x256xf32>,
    return
  }
  func.func @transform_0(%arg0: i32, %arg1: i32) -> (i32, i32, i32) {
    %c0_i32 = arith.constant 0 : i32
    %c0_i32_0 = arith.constant 0 : i32
    return %arg0, %c0_i32, %arg1 : i32, i32, i32
  }
  func.func @transform_1(%arg0: i32, %arg1: i32) -> (i32, i32) {
    %c0_i32 = arith.constant 0 : i32
    %c0_i32_0 = arith.constant 0 : i32
    %c0_i32_1 = arith.constant 0 : i32
    return %c0_i32, %c0_i32_0 : i32, i32
  }
  func.func @transform_2(%arg0: i32, %arg1: i32) -> (i32, i32) {
    %c0_i32 = arith.constant 0 : i32
    %c0_i32_0 = arith.constant 0 : i32
    %c0_i32_1 = arith.constant 0 : i32
    return %c0_i32, %c0_i32_0 : i32, i32
  }
  func.func @transform_3(%arg0: i32, %arg1: i32) -> (i32, i32) {
    %c0_i32 = arith.constant 0 : i32
    %c0_i32_0 = arith.constant 0 : i32
    %c0_i32_1 = arith.constant 0 : i32
    return %c0_i32, %c0_i32_0 : i32, i32
  }
  func.func @transform_4(%arg0: i32, %arg1: i32) -> (i32, i32) {
    %c0_i32 = arith.constant 0 : i32
    %c0_i32_0 = arith.constant 0 : i32
    %c0_i32_1 = arith.constant 0 : i32
    return %c0_i32, %c0_i32_0 : i32, i32
  }
  func.func @transform_5(%arg0: i32, %arg1: i32) -> (i32, i32) {
    %c0_i32 = arith.constant 0 : i32
    %c0_i32_0 = arith.constant 0 : i32
    %c0_i32_1 = arith.constant 0 : i32
    return %c0_i32, %c0_i32_0 : i32, i32
  }
  func.func @transform_6(%arg0: i32, %arg1: i32) -> (i32, i32) {
    %c0_i32 = arith.constant 0 : i32
    %c0_i32_0 = arith.constant 0 : i32
    %c0_i32_1 = arith.constant 0 : i32
    return %c0_i32, %c0_i32_0 : i32, i32
  }
  func.func @transform_7(%arg0: i32, %arg1: i32) -> (i32, i32, i32) {
    %c0_i32 = arith.constant 0 : i32
    %c0_i32_0 = arith.constant 0 : i32
    return %arg0, %c0_i32, %arg1 : i32, i32, i32
  }
}

</mosaic_0001>

<bundles_post_ra>
// kernel: tpu_custom_call.1
= control target key start
LH: loop header
LB: loop body
LE: loop exit
PB: predicated region body
PF: predicated region fallthrough
CT: control target
= control target key end

     0   :  { %12 = vsyncpa [#allocation3], 0  ;;  %s1618_s0 = inlined_call_operand.hbm [shape: f32[2,16,256], index: 0, kind: input, shape index: {}, may-alias: {0,7}]   ;;  %s1619_s1 = inlined_call_operand.vmem [shape: f32[48,16], index: 1, kind: input, shape index: {}]   ;;  %s1620_s2 = inlined_call_operand.vmem [shape: f32[16,1], index: 2, kind: input, shape index: {}]   ;;  %s1621_s3 = inlined_call_operand.vmem [shape: f32[48,16], index: 3, kind: input, shape index: {}]   ;;  %s1622_s4 = inlined_call_operand.vmem [shape: f32[16,1], index: 4, kind: input, shape index: {}]   ;;  %s1623_s5 = inlined_call_operand.vmem [shape: f32[32,16], index: 5, kind: input, shape index: {}]   ;;  %s1624_s6 = inlined_call_operand.vmem [shape: f32[16,32], index: 6, kind: input, shape index: {}]   ;;  %s1625_s7 = inlined_call_operand.hbm [shape: f32[2,16,256], index: 7, kind: output, shape index: {}, may-alias: {0,7}]  }
   0x1   :  { %14 = vsyncpa [#allocation3 + $0x1], 0 }
   0x2   :  { %15 = vsyncpa [#allocation4], 0 }
   0x3   :  { %17 = vsyncpa [#allocation4 + $0x1], 0  ;;  %s1323_s24 = smov 0   ;;  %s1325_s25 = smov 0  }
   0x4   :  { %s1327_s26 = smov 0   ;;  %s1329_s27 = smov 0  }
   0x5   :  { %s1331_s28 = smov 0   ;;  %s1333_s29 = smov 0  }
   0x6 LB: > { %s1000_s30 = sadd.s32 4294967295, %s1273_s29   ;;  %s1001_s8 = sadd.s32 4294967294, %s1273_s29   ;;  %s1273_s29 = sphi %s1333_s29, %s23_s29   ;;  %s1269_s28 = sphi %s1331_s28, %s1640_s28   ;;  %s1265_s27 = sphi %s1329_s27, %s1639_s27   ;;  %s1261_s26 = sphi %s1327_s26, %s1638_s26   ;;  %s1257_s25 = sphi %s1325_s25, %s1637_s25   ;;  %s1253_s24 = sphi %s1323_s24, %s1636_s24  }
   0x7   : > { %s35_s9 = sadd.s32 1, %s1269_s28  ;;  %s44_s10 = sadd.s32 1, %s1261_s26 }
   0x8   : > { %p37_p0 = scmp.ge.s32.totalorder %s35_s9, 2  ;;  %p51_p1 = scmp.ne.s32.totalorder %s1261_s26, %s1257_s25 }
   0x9   : > { %p52_p2 = scmp.eq.s32.totalorder %s1273_s29, 0  ;;  %p57_p3 = scmp.ne.s32.totalorder %s1257_s25, %s1253_s24 }
   0xa   : > { %s1642_s9 = smov (%p37_p0, %s35_s9), 0  ;;  %p58_p5 = scmp.eq.s32.totalorder %s1000_s30, 0 }
   0xb   : > { %p1364_p4 = por %p52_p2, %p51_p1  ;;  %s39_s12 = ssub.s32 %s1269_s28, %s1642_s9 }
   0xc   : > { %p209_p6 = scmp.eq.s32.totalorder %s1000_s30, 1  ;;  %p42_p7 = scmp.eq.s32.totalorder %s39_s12, 0 }
   0xd   : > { %p1370_p8 = por %p58_p5, %p57_p3  ;;  %p215_p10 = scmp.eq.s32.totalorder %s1001_s8, 1 }
   0xe   : > { %p1374_p9 = por %p209_p6, %p51_p1  ;;  %p1083_p13 = scmp.lt.s32.totalorder %s1273_s29, 2 }
   0xf   : > { %s1379_s15 = scalar_select %p42_p7, %s1261_s26, %s44_s10  }
  0x10   : > { %s1629_s14 = scalar_select %p1374_p9, 1, 0 }
  0x11   : > { %p1381_p11 = por %p215_p10, %p57_p3  ;;  %s253_s17 = sand.u32 1, %s1261_s26  }
  0x12   : > { %s1004_s18 = sshll.u32 %s253_s17, 5  ;;  %s1033_s19 = sshll.u32 %s1269_s28, 9 }
  0x13   : > { %s1630_s16 = scalar_select %p1381_p11, 1, 0 }
  0x14   : > { %s1392_s22 = scalar_lea.hbm %s1618_s0, %s1033_s19  ;;  %s257_s23 = scalar_lea.vmem [#allocation2], %s1004_s18 }
  0x15   : > { %s266_s30 = sshll.u32 %s257_s23, 4  ;;  %p1398_p0 = pnand %p1083_p13, %p1364_p4  ;;  %s1394_s30 = int_to_ptr.vmem [resolvable:$true] %s266_s30 }
  0x16   : > { %s1403_s10 = scalar_lea.sflag [#allocation3], %s253_s17  ;;  %s1161_s12 = scalar_lea.hbm %s1392_s22, 512 }
  0x17   : > { %p1162_p2 = scmp.ne.s32.totalorder %s1392_s22, %s1161_s12  ;;  %p1163_p3 = pneg %p1398_p0 }
  0x18   : > { %s1166_s11 = scalar_lea.hbm %s1618_s0, 1024  ;;  %p1167_p4 = scmp.lt.u32.totalorder %s1392_s22, %s1618_s0 }
  0x19   : > { %p1164_p5 = pnand %p1163_p3, %p1162_p2  ;;  %p1168_p7 = scmp.lt.u32.totalorder %s1166_s11, %s1161_s12 }
  0x1a   : > { %p1170_p13 = scmp.lt.u32.totalorder %s1161_s12, %s1392_s22 }
  0x1b   : > { %p1165_p6 = pneg %p1164_p5  ;;  %p1169_p10 = por %p1168_p7, %p1167_p4 }
  0x1d   : > { %p1171_p12 = por %p1170_p13, %p1169_p10 }
  0x1f   : > { %p1172_p1 = pnand %p1171_p12, %p1165_p6 }
  0x21   : > { %1175 = shalt.err (!%p1172_p1)
}
  0x22   : > { %s1176_s17 = scalar_lea.vmem %s1394_s30, 512  ;;  %s1275_s23 = smov [#allocation2]  }
  0x23   : > { %p1177_p2 = scmp.ne.s32.totalorder %s1394_s30, %s1176_s17  ;;  %s1181_s18 = sshll.u32 %s1275_s23, 4  ;;  %s1182_s18 = int_to_ptr.vmem [resolvable:$false] %s1181_s18 }
  0x24   : > { %s1183_s19 = scalar_lea.vmem %s1182_s18, 1024  ;;  %p1184_p9 = scmp.lt.s32.totalorder %s1394_s30, %s1182_s18 }
  0x25   : > { %p1179_p5 = pnand %p1177_p2, %p1163_p3  ;;  %p1185_p4 = scmp.lt.s32.totalorder %s1183_s19, %s1176_s17 }
  0x27   : > { %p1180_p11 = pneg %p1179_p5  ;;  %p1186_p7 = por %p1185_p4, %p1184_p9 }
  0x29   : > { %p1187_p10 = pnand %p1186_p7, %p1180_p11 }
  0x2b   : > { %1190 = shalt.err (!%p1187_p10)
}
  0x2c   : > { %s1276_s12 = smov 256   ;;  %s1277_s11 = smov 16  }
  0x2d   : > { %1078 = dma.hbm_to_vmem [thread:$0]  (!%p1398_p0), %s1392_s22, 512, %s1394_s30, %s1403_s10, %s1276_s12, %s1276_s12, %s1277_s11  }
  0x2e   : > { %p274_p12 = scmp.lt.s32.totalorder %s1273_s29, 3  ;;  %p1632_p1 = scmp.ge.s32.totalorder %s1273_s29, 1 }
  0x30   : > { %p275_p3 = pnand %p1632_p1, %p274_p12 }
  0x31   : > { %s1435_s20 = sand.u32 (!%p275_p3), 1, %s1257_s25  }
  0x32   : > { %278 = sbr.rel (%p275_p3) target bundleno = 1056 (0x420), region = 48  ;;  %s1008_s21 = sshll.u32 (!%p275_p3), %s1435_s20, 5 }
  0x33   : > { %s281_s17 = scalar_lea.sflag (!%p275_p3), [#allocation3], %s1435_s20  ;;  %s284_s23 = scalar_lea.vmem (!%p275_p3), [#allocation2], %s1008_s21 }
  0x39   : > { %1244 = dma.done.wait (%p1370_p8), %s281_s17, 512  }
  0x3a   : > { %1246 = vsyncadd (%p1370_p8), %s281_s17, 4294966784  ;;  %v1278_v0 = vmov 0.0   ;;  %v1279_v1 = vmov 0   ;;  %v1447_v2 = vld [vmem:[%s284_s23 + $0x8] sm:$0xff]  ;;  %v1449_v3 = vld [vmem:[%s284_s23 + $0x18] sm:$0xff]  ;;  %vm327_vm0 = vcmask 130048  }
  0x3b   : > { %410 = vmatprep.mubr.f32.mxu1 %v1278_v0  ;;  %1139 = vset.pattern.permute.xlu0 %v1279_v1  ;;  %v1451_v4 = vld [vmem:[%s284_s23] sm:$0xff]  ;;  %v1035_v5 = vpack.c.bf16 %v1449_v3, %v1447_v2  ;;  %v1455_v6 = vld [vmem:[%s284_s23 + $0x10] sm:$0xff]  ;;  %v448_v10 = vld [vmem:[%s1620_s2 + $0x8] sm:$0xff]  ;;  %vm805_vm1 = vcmask 261120   ;;  %s314_s13 = scalar_lea.vmem [#allocation5], %s1008_s21  ;;  %s1034_s30 = sshll.u32 %s1265_s27, 9 }
  0x3c   : > { %555 = vmatprep.mubr.f32.mxu0 %v1278_v0  ;;  %1140 = vset.pattern.permute.xlu1 %v1279_v1  ;;  %v1037_v7 = vpack.c.bf16 %v1455_v6, %v1451_v4  ;;  %v447_v8 = vld [vmem:[%s1620_s2] sm:$0xff]  ;;  %v322_v11 = vld [vmem:[%s1619_s1 + $0x8] sm:$0xff]  ;;  %v469_v32 = vld [vmem:[%s1621_s3 + $0x10] sm:$0xff]  ;;  %s913_s22 = sshll.u32 %s314_s13, 4  ;;  %s1568_s21 = scalar_lea.hbm %s1625_s7, %s1034_s30  ;;  %s1562_s22 = int_to_ptr.vmem [resolvable:$true] %s913_s22 }
  0x3d   : > { %1036 = vmatprep.subr.bf16.mxu1 %v1035_v5  ;;  %451 = vperm.xlu0 %1139, %v447_v8   ;;  %v321_v9 = vld [vmem:[%s1619_s1] sm:$0xff]  ;;  %v593_v13 = vld [vmem:[%s1622_s4 + $0x8] sm:$0xff]  ;;  %v470_v33 = vld [vmem:[%s1621_s3 + $0x18] sm:$0xff]  ;;  %s898_s27 = scalar_lea.sflag [#allocation4], %s1435_s20  ;;  %s1191_s18 = scalar_lea.vmem %s1562_s22, 512 }
  0x3e   : > { %1038 = vmatpush1.bf16.msra.mxu1 %v1037_v7  ;;  %v592_v12 = vld [vmem:[%s1622_s4] sm:$0xff]  ;;  %v468_v31 = vld [vmem:[%s1621_s3 + $0x8] sm:$0xff]  ;;  %v323_v36 = vld [vmem:[%s1619_s1 + $0x10] sm:$0xff]  ;;  %p1192_p8 = scmp.ne.s32.totalorder %s1562_s22, %s1191_s18  ;;  %p1633_p9 = scmp.ne.s32.totalorder %s1629_s14, 0 }
  0x3f   : > { %596 = vperm.xlu1 %1140, %v592_v12   ;;  %v467_v30 = vld [vmem:[%s1621_s3] sm:$0xff]  ;;  %v472_v35 = vld [vmem:[%s1621_s3 + $0x28] sm:$0xff]  ;;  %v324_v37 = vld [vmem:[%s1619_s1 + $0x18] sm:$0xff]  ;;  %s1280_s19 = smov [#allocation5]  }
  0x40   : > { %v471_v34 = vld [vmem:[%s1621_s3 + $0x20] sm:$0xff]  ;;  %v326_v39 = vld [vmem:[%s1619_s1 + $0x28] sm:$0xff]  ;;  %v622_v58 = vld [vmem:[%s1623_s5 + $0x10] sm:$0xff]  ;;  %p1193_p11 = pnand %p1192_p8, %p1633_p9  ;;  %s1195_s12 = sshll.u32 %s1280_s19, 4  ;;  %s1196_s12 = int_to_ptr.vmem [resolvable:$false] %s1195_s12 }
  0x41   : > { %1010 = vmatmul.mubr.msk.f32.vlgmr.msra.gmra.mrb[0].mxu1 %vm327_vm0, %v321_v9  ;;  %456 = vperm.xlu0 %1139, %v448_v10   ;;  %v325_v38 = vld [vmem:[%s1619_s1 + $0x20] sm:$0xff]  ;;  %v621_v57 = vld [vmem:[%s1623_s5 + $0x8] sm:$0xff]  ;;  %v623_v59 = vld [vmem:[%s1623_s5 + $0x18] sm:$0xff]  ;;  %s1197_s11 = scalar_lea.vmem %s1196_s12, 1024  ;;  %p1198_p6 = scmp.lt.s32.totalorder %s1562_s22, %s1196_s12 }
  0x42   : > { %416 = vmatprep.mubr.f32.mxu1 %v1278_v0  ;;  %v620_v56 = vld [vmem:[%s1623_s5] sm:$0xff]  ;;  %p1194_p0 = pneg %p1193_p11  ;;  %p1199_p13 = scmp.lt.s32.totalorder %s1197_s11, %s1191_s18 }
  0x43   : > { %601 = vperm.xlu1 %1140, %v593_v13  }
  0x44   : > { %p1200_p2 = por %p1199_p13, %p1198_p6 }
  0x45   : > { %1011 = vmatmul.mubr.msk.f32.gmra.mrb[2].mxu1 %vm327_vm0, %v322_v11 }
  0x46   : > { %422 = vmatprep.mubr.f32.mxu1 %v1278_v0  ;;  %p1201_p5 = pnand %p1200_p2, %p1194_p0 }
  0x49   : > { %1012 = vmatmul.mubr.msk.f32.gmra.mrb[4].mxu1 %vm327_vm0, %v323_v36 }
  0x4a   : > { %428 = vmatprep.mubr.f32.mxu1 %v1278_v0 }
  0x4d   : > { %1013 = vmatmul.mubr.msk.f32.gmra.mrb[6].mxu1 %vm327_vm0, %v324_v37 }
  0x4e   : > { %434 = vmatprep.mubr.f32.mxu1 %v1278_v0 }
  0x51   : > { %1014 = vmatmul.mubr.msk.f32.gmra.mrb[8].mxu1 %vm327_vm0, %v325_v38 }
  0x52   : > { %440 = vmatprep.mubr.f32.mxu1 %v1278_v0 }
  0x55   : > { %1015 = vmatmul.mubr.msk.f32.gmra.mrb[10].mxu1 %vm327_vm0, %v326_v39 }
  0x56   : > { %876 = vmatprep.mubr.f32.mxu1 %v1278_v0 }
  0xbc   : > { %v452_v14 = vpop.permute.xlu0 %451 }
  0xbe   : > { %v597_v40 = vpop.permute.xlu1 %596 }
  0xc0   : > { %v457_v18 = vpop.permute.xlu0 %456 }
  0xc2   : > { %v602_v44 = vpop.permute.xlu1 %601 }
 0x114   : > { %v412_v15 = vpop.f32.mrb[0].mxu1 }
 0x115   : > { %v414_v16 = vpop.f32.mrb[1].mxu1  ;;  %v459_v17 = vadd.f32 %v452_v14, %v412_v15 }
 0x116   : > { %v460_v19 = vadd.f32 %v452_v14, %v414_v16 }
 0x117   : > { %v463_v24 = vmax.f32 %v459_v17, 0.0 }
 0x118   : > { %v418_v20 = vpop.f32.mrb[2].mxu1  ;;  %v464_v26 = vmax.f32 %v460_v19, 0.0 }
 0x119   : > { %v461_v21 = vadd.f32 %v457_v18, %v418_v20  ;;  %v420_v22 = vpop.f32.mrb[3].mxu1 }
 0x11a   : > { %v462_v23 = vadd.f32 %v457_v18, %v420_v22 }
 0x11b   : > { %v465_v25 = vmax.f32 %v461_v21, 0.0 }
 0x11c   : > { %v466_v27 = vmax.f32 %v462_v23, 0.0  ;;  %v424_v60 = vpop.f32.mrb[4].mxu1 }
 0x11d   : > { %v1041_v28 = vpack.c.bf16 %v465_v25, %v463_v24  ;;  %v426_v61 = vpop.f32.mrb[5].mxu1 }
 0x11e   : > { %v1039_v29 = vpack.c.bf16 %v466_v27, %v464_v26 }
 0x120   : > { %1040 = vmatprep.subr.bf16.mxu0 %v1039_v29  ;;  %v430_v62 = vpop.f32.mrb[6].mxu1 }
 0x121   : > { %1042 = vmatpush1.bf16.msra.mxu0 %v1041_v28  ;;  %v432_v63 = vpop.f32.mrb[7].mxu1 }
 0x124   : > { %1016 = vmatmul.mubr.msk.f32.vlgmr.msra.gmra.mrb[0].mxu0 %vm327_vm0, %v467_v30  ;;  %v436_v1 = vpop.f32.mrb[8].mxu1 }
 0x125   : > { %561 = vmatprep.mubr.f32.mxu0 %v1278_v0  ;;  %v438_v5 = vpop.f32.mrb[9].mxu1 }
 0x128   : > { %1017 = vmatmul.mubr.msk.f32.gmra.mrb[2].mxu0 %vm327_vm0, %v468_v31  ;;  %v442_v7 = vpop.f32.mrb[10].mxu1 }
 0x129   : > { %567 = vmatprep.mubr.f32.mxu0 %v1278_v0  ;;  %v444_v8 = vpop.f32.mrb[11].mxu1 }
 0x12c   : > { %1018 = vmatmul.mubr.msk.f32.gmra.mrb[4].mxu0 %vm327_vm0, %v469_v32 }
 0x12d   : > { %573 = vmatprep.mubr.f32.mxu0 %v1278_v0 }
 0x130   : > { %1019 = vmatmul.mubr.msk.f32.gmra.mrb[6].mxu0 %vm327_vm0, %v470_v33 }
 0x131   : > { %579 = vmatprep.mubr.f32.mxu0 %v1278_v0 }
 0x134   : > { %1020 = vmatmul.mubr.msk.f32.gmra.mrb[8].mxu0 %vm327_vm0, %v471_v34 }
 0x135   : > { %585 = vmatprep.mubr.f32.mxu0 %v1278_v0 }
 0x138   : > { %1021 = vmatmul.mubr.msk.f32.gmra.mrb[10].mxu0 %vm327_vm0, %v472_v35 }
 0x139   : > { %700 = vmatprep.mubr.f32.mxu0 %v1278_v0 }
 0x1f7   : > { %v557_v41 = vpop.f32.mrb[0].mxu0 }
 0x1f8   : > { %v559_v42 = vpop.f32.mrb[1].mxu0  ;;  %v604_v43 = vadd.f32 %v597_v40, %v557_v41 }
 0x1f9   : > { %v605_v45 = vadd.f32 %v597_v40, %v559_v42 }
 0x1fa   : > { %v608_v50 = vmax.f32 %v604_v43, 0.0 }
 0x1fb   : > { %v563_v46 = vpop.f32.mrb[2].mxu0  ;;  %v609_v52 = vmax.f32 %v605_v45, 0.0 }
 0x1fc   : > { %v606_v47 = vadd.f32 %v602_v44, %v563_v46  ;;  %v565_v48 = vpop.f32.mrb[3].mxu0 }
 0x1fd   : > { %v607_v49 = vadd.f32 %v602_v44, %v565_v48 }
 0x1fe   : > { %v610_v51 = vmax.f32 %v606_v47, 0.0 }
 0x1ff   : > { %v611_v53 = vmax.f32 %v607_v49, 0.0 }
 0x200   : > { %v1045_v54 = vpack.c.bf16 %v610_v51, %v608_v50 }
 0x201   : > { %v1043_v55 = vpack.c.bf16 %v611_v53, %v609_v52 }
 0x203   : > { %1044 = vmatprep.subr.bf16.mxu0 %v1043_v55 }
 0x204   : > { %1046 = vmatpush1.bf16.msra.mxu0 %v1045_v54 }
 0x207   : > { %1022 = vmatmul.mubr.msk.f32.vlgmr.msra.gmra.mrb[4].mxu0 %vm327_vm0, %v620_v56 }
 0x208   : > { %706 = vmatprep.mubr.f32.mxu0 %v1278_v0 }
 0x20b   : > { %1023 = vmatmul.mubr.msk.f32.gmra.mrb[6].mxu0 %vm327_vm0, %v621_v57 }
 0x20c   : > { %712 = vmatprep.mubr.f32.mxu0 %v1278_v0 }
 0x20f   : > { %1024 = vmatmul.mubr.msk.f32.gmra.mrb[8].mxu0 %vm327_vm0, %v622_v58 }
 0x210   : > { %718 = vmatprep.mubr.f32.mxu0 %v1278_v0 }
 0x213   : > { %1025 = vmatmul.mubr.msk.f32.gmra.mrb[10].mxu0 %vm327_vm0, %v623_v59 }
 0x2da   : > { %v702_v9 = vpop.f32.mrb[4].mxu0 }
 0x2db   : > { %v1055_v10 = vadd.f32 %v702_v9, %v424_v60  ;;  %v704_v11 = vpop.f32.mrb[5].mxu0 }
 0x2dc   : > { %v1056_v12 = vadd.f32 %v704_v11, %v426_v61 }
 0x2de   : > { %v708_v13 = vpop.f32.mrb[6].mxu0 }
 0x2df   : > { %v1057_v14 = vadd.f32 %v708_v13, %v430_v62  ;;  %v710_v15 = vpop.f32.mrb[7].mxu0 }
 0x2e0   : > { %v1058_v16 = vadd.f32 %v710_v15, %v432_v63 }
 0x2e2   : > { %v714_v17 = vpop.f32.mrb[8].mxu0 }
 0x2e3   : > { %v1059_v18 = vadd.f32 %v714_v17, %v436_v1  ;;  %v716_v19 = vpop.f32.mrb[9].mxu0 }
 0x2e4   : > { %v1060_v20 = vadd.f32 %v716_v19, %v438_v5 }
 0x2e5   : > { %v733_v21 = vmax.f32 %v1055_v10, %v1059_v18 }
 0x2e6   : > { %v742_v22 = vmax.f32 %v1056_v12, %v1060_v20  ;;  %v720_v23 = vpop.f32.mrb[10].mxu0 }
 0x2e7   : > { %v1061_v24 = vadd.f32 %v720_v23, %v442_v7  ;;  %v722_v25 = vpop.f32.mrb[11].mxu0 }
 0x2e8   : > { %v1062_v26 = vadd.f32 %v722_v25, %v444_v8 }
 0x2e9   : > { %v734_v27 = vmax.f32 %v1057_v14, %v1061_v24 }
 0x2ea   : > { %v743_v28 = vmax.f32 %v1058_v16, %v1062_v26 }
 0x2eb   : > { %v735_v29 = vmax.f32 %v733_v21, %v734_v27 }
 0x2ec   : > { %v744_v30 = vmax.f32 %v742_v22, %v743_v28 }
 0x2ed   : > { %v736_v31 = vrot.slane %v735_v29, 4 }
 0x2ee   : > { %v745_v32 = vrot.slane %v744_v30, 4 }
 0x2ef   : > { %v737_v33 = vmax.f32 %v735_v29, %v736_v31 }
 0x2f0   : > { %v746_v34 = vmax.f32 %v744_v30, %v745_v32 }
 0x2f1   : > { %v738_v35 = vrot.slane %v737_v33, 2 }
 0x2f2   : > { %v747_v36 = vrot.slane %v746_v34, 2 }
 0x2f3   : > { %v739_v37 = vmax.f32 %v737_v33, %v738_v35 }
 0x2f4   : > { %v748_v38 = vmax.f32 %v746_v34, %v747_v36 }
 0x2f5   : > { %v740_v39 = vrot.slane %v739_v37, 1 }
 0x2f6   : > { %v749_v40 = vrot.slane %v748_v38, 1 }
 0x2f7   : > { %v741_v41 = vmax.f32 %v739_v37, %v740_v39 }
 0x2f8   : > { %v750_v42 = vmax.f32 %v748_v38, %v749_v40  ;;  %v803_v40 = vld [vmem:[%s1624_s6] sm:$0xff] }
 0x2f9   : > { %v751_v43 = vsub.f32 %v1055_v10, %v741_v41  ;;  %v753_v44 = vsub.f32 %v1057_v14, %v741_v41  ;;  %v755_v45 = vsub.f32 %v1059_v18, %v741_v41  ;;  %v757_v46 = vsub.f32 %v1061_v24, %v741_v41  ;;  %v804_v41 = vld [vmem:[%s1624_s6 + $0x8] sm:$0xff] }
 0x2fa   : > { %v752_v47 = vsub.f32 %v1056_v12, %v750_v42  ;;  %v754_v48 = vsub.f32 %v1058_v16, %v750_v42  ;;  %v756_v49 = vsub.f32 %v1060_v20, %v750_v42  ;;  %v758_v50 = vsub.f32 %v1062_v26, %v750_v42 }
 0x2fb   : > { %v759_v51 = vmul.f32 1.442695, %v751_v43  ;;  %v763_v52 = vmul.f32 1.442695, %v753_v44  ;;  %v767_v53 = vmul.f32 1.442695, %v755_v45 }
 0x2fc   : > { %v771_v54 = vmul.f32 1.442695, %v757_v46  ;;  %v761_v55 = vmul.f32 1.442695, %v752_v47  ;;  %v765_v56 = vmul.f32 1.442695, %v754_v48 }
 0x2fd   : > { %1141 = vpow2.f32 %v759_v51  ;;  %v769_v57 = vmul.f32 1.442695, %v756_v49  ;;  %v773_v58 = vmul.f32 1.442695, %v758_v50 }
 0x2fe   : > { %1143 = vpow2.f32 %v763_v52 }
 0x2ff   : > { %1145 = vpow2.f32 %v767_v53 }
 0x300   : > { %1147 = vpow2.f32 %v771_v54 }
 0x301   : > { %1149 = vpow2.f32 %v761_v55 }
 0x302   : > { %1151 = vpow2.f32 %v765_v56 }
 0x303   : > { %1153 = vpow2.f32 %v769_v57 }
 0x304   : > { %1155 = vpow2.f32 %v773_v58 }
 0x307   : > { %v1142_v59 = vpop.eup %1141 }
 0x308   : > { %v1144_v60 = vpop.eup %1143 }
 0x309   : > { %v1146_v61 = vpop.eup %1145  ;;  %v775_v62 = vadd.f32 %v1144_v60, %v1142_v59 }
 0x30a   : > { %v1148_v63 = vpop.eup %1147 }
 0x30b   : > { %v1150_v1 = vpop.eup %1149  ;;  %v776_v5 = vadd.f32 %v1146_v61, %v775_v62 }
 0x30c   : > { %v1152_v7 = vpop.eup %1151 }
 0x30d   : > { %v777_v8 = vadd.f32 %v1148_v63, %v776_v5  ;;  %v784_v9 = vadd.f32 %v1152_v7, %v1150_v1  ;;  %v1154_v10 = vpop.eup %1153 }
 0x30e   : > { %v1156_v13 = vpop.eup %1155 }
 0x30f   : > { %v778_v11 = vrot.slane %v777_v8, 4  ;;  %v785_v12 = vadd.f32 %v1154_v10, %v784_v9 }
 0x311   : > { %v779_v14 = vadd.f32 %v778_v11, %v777_v8  ;;  %v786_v15 = vadd.f32 %v1156_v13, %v785_v12 }
 0x313   : > { %v780_v16 = vrot.slane %v779_v14, 2  ;;  %v787_v17 = vrot.slane %v786_v15, 4 }
 0x315   : > { %v781_v18 = vadd.f32 %v780_v16, %v779_v14  ;;  %v788_v19 = vadd.f32 %v787_v17, %v786_v15 }
 0x317   : > { %v782_v20 = vrot.slane %v781_v18, 1  ;;  %v789_v21 = vrot.slane %v788_v19, 2 }
 0x319   : > { %v783_v22 = vadd.f32 %v782_v20, %v781_v18  ;;  %v790_v23 = vadd.f32 %v789_v21, %v788_v19 }
 0x31b   : > { %1157 = vrcp.f32 %v783_v22  ;;  %v791_v24 = vrot.slane %v790_v23, 1 }
 0x31d   : > { %v792_v25 = vadd.f32 %v791_v24, %v790_v23 }
 0x31f   : > { %1159 = vrcp.f32 %v792_v25 }
 0x325   : > { %v1158_v26 = vpop.eup %1157 }
 0x326   : > { %v795_v27 = vmul.f32 %v1158_v26, %v1142_v59  ;;  %v797_v28 = vmul.f32 %v1158_v26, %v1144_v60  ;;  %v799_v29 = vmul.f32 %v1158_v26, %v1146_v61  ;;  %v801_v30 = vmul.f32 %v1158_v26, %v1148_v63 }
 0x328   : > { %v1049_v31 = vpack.c.bf16 %v797_v28, %v795_v27  ;;  %v1053_v32 = vpack.c.bf16 %v801_v30, %v799_v29 }
 0x329   : > { %v1160_v33 = vpop.eup %1159 }
 0x32a   : > { %v796_v34 = vmul.f32 %v1160_v33, %v1150_v1  ;;  %v798_v35 = vmul.f32 %v1160_v33, %v1152_v7  ;;  %v800_v36 = vmul.f32 %v1160_v33, %v1154_v10  ;;  %v802_v37 = vmul.f32 %v1160_v33, %v1156_v13 }
 0x32c   : > { %v1047_v38 = vpack.c.bf16 %v798_v35, %v796_v34  ;;  %v1051_v39 = vpack.c.bf16 %v802_v37, %v800_v36 }
 0x32e   : > { %1048 = vmatprep.subr.bf16.mxu1 %v1047_v38 }
 0x32f   : > { %1050 = vmatpush1.bf16.msra.mxu1 %v1049_v31 }
 0x330   : > { %1052 = vmatprep.subr.bf16.mxu1 %v1051_v39 }
 0x333   : > { %1054 = vmatpush1.bf16.msra.mxu1 %v1053_v32 }
 0x336   : > { %1026 = vmatmul.mubr.msk.f32.vlgmr.msra.gmra.mrb[12].mxu1 %vm805_vm1, %v803_v40 }
 0x337   : > { %882 = vmatprep.mubr.f32.mxu1 %v1278_v0 }
 0x33a   : > { %1027 = vmatmul.mubr.msk.f32.gmra.mrb[14].mxu1 %vm805_vm1, %v804_v41 }
 0x409   : > { %v878_v42 = vpop.f32.mrb[12].mxu1 }
 0x40a   : > { %v889_v43 = vadd.f32 %v878_v42, %v1451_v4  ;;  %v880_v44 = vpop.f32.mrb[13].mxu1 }
 0x40b   : > { %v890_v45 = vadd.f32 %v880_v44, %v1447_v2 }
 0x40c   : > { %893 = vst [vmem:[%s314_s13] sm:$0xff] %v889_v43 }
 0x40d   : > { %894 = vst [vmem:[%s314_s13 + $0x8] sm:$0xff] %v890_v45  ;;  %v884_v0 = vpop.f32.mrb[14].mxu1 }
 0x40e   : > { %v891_v46 = vadd.f32 %v884_v0, %v1455_v6  ;;  %v886_v4 = vpop.f32.mrb[15].mxu1 }
 0x40f   : > { %v892_v47 = vadd.f32 %v886_v4, %v1449_v3 }
 0x410   : > { %895 = vst [vmem:[%s314_s13 + $0x10] sm:$0xff] %v891_v46 }
 0x411   : > { %896 = vst [vmem:[%s314_s13 + $0x18] sm:$0xff] %v892_v47 }
 0x412   : > { %1204 = shalt.err (!%p1201_p5)
}
 0x413   : > { %s1205_s17 = scalar_lea.hbm %s1568_s21, 512  ;;  %s1209_s30 = scalar_lea.hbm %s1625_s7, 1024 }
 0x414   : > { %p1206_p4 = scmp.ne.s32.totalorder %s1568_s21, %s1205_s17  ;;  %p1210_p12 = scmp.lt.u32.totalorder %s1568_s21, %s1625_s7 }
 0x415   : > { %p1211_p1 = scmp.lt.u32.totalorder %s1209_s30, %s1205_s17  ;;  %p1213_p8 = scmp.lt.u32.totalorder %s1205_s17, %s1568_s21 }
 0x416   : > { %p1207_p7 = pnand %p1206_p4, %p1633_p9 }
 0x417   : > { %p1212_p3 = por %p1211_p1, %p1210_p12 }
 0x418   : > { %p1208_p10 = pneg %p1207_p7 }
 0x419   : > { %p1214_p11 = por %p1213_p8, %p1212_p3 }
 0x41b   : > { %p1215_p0 = pnand %p1214_p11, %p1208_p10 }
 0x41d   : > { %1218 = shalt.err (!%p1215_p0)
}
 0x41e   : > { %s1281_s18 = smov 256   ;;  %s1282_s19 = smov 16  }
 0x41f   : > { %1073 = dma.vmem_to_hbm [thread:$0]  (%p1633_p9), %s1562_s22, 512, %s1568_s21, %s898_s27, %s1281_s18, %s1281_s18, %s1282_s19  }
 0x420 PF: > { %s928_s12 = sand.u32 1, %s1253_s24   ;;  %p1634_p6 = scmp.ne.s32.totalorder %s1630_s16, 0 }
 0x421   : > { %p1635_p13 = scmp.ge.s32.totalorder %s1273_s29, 2  ;;  %s929_s11 = scalar_lea.sflag [#allocation4], %s928_s12 }
 0x423   : > { %p1080_p2 = pnand %p1635_p13, %p1634_p6 }
 0x425   : > { %1248 = dma.done.wait (!%p1080_p2), %s929_s11, 512  }
 0x426   : > { %1250 = vsyncadd (!%p1080_p2), %s929_s11, 4294966784  ;;  %s23_s29 = sadd.s32 1, %s1273_s29   ;;  %s1636_s24 = smov %s1257_s25 }
 0x427   : > { %p20_p5 = scmp.ge.s32.totalorder %s23_s29, 4   ;;  %s1637_s25 = smov %s1261_s26 }
 0x428   : > { %s1638_s26 = smov %s1379_s15  ;;  %s1639_s27 = smov %s1269_s28 }
 0x429   : > { %s1640_s28 = smov %s1642_s9  ;;  %22 = sbr.rel (!%p20_p5) target bundleno = 6 (0x6), region = 93 }
 0x430   :  { %934 = vsyncpa [#allocation3], 1 }
 0x431   :  { %936 = vsyncpa [#allocation3 + $0x1], 1 }
 0x432   :  { %937 = vsyncpa [#allocation4], 1 }
 0x433   :  { %939 = vsyncpa [#allocation4 + $0x1], 1 }

// kernel: tpu_custom_call.1
= control target key start
LH: loop header
LB: loop body
LE: loop exit
PB: predicated region body
PF: predicated region fallthrough
CT: control target
= control target key end

     0   :  { %12 = vsyncpa [#allocation3], 0  ;;  %s1618_s0 = inlined_call_operand.hbm [shape: f32[2,16,256], index: 0, kind: input, shape index: {}, may-alias: {0,7}]   ;;  %s1619_s1 = inlined_call_operand.vmem [shape: f32[48,16], index: 1, kind: input, shape index: {}]   ;;  %s1620_s2 = inlined_call_operand.vmem [shape: f32[16,1], index: 2, kind: input, shape index: {}]   ;;  %s1621_s3 = inlined_call_operand.vmem [shape: f32[48,16], index: 3, kind: input, shape index: {}]   ;;  %s1622_s4 = inlined_call_operand.vmem [shape: f32[16,1], index: 4, kind: input, shape index: {}]   ;;  %s1623_s5 = inlined_call_operand.vmem [shape: f32[32,16], index: 5, kind: input, shape index: {}]   ;;  %s1624_s6 = inlined_call_operand.vmem [shape: f32[16,32], index: 6, kind: input, shape index: {}]   ;;  %s1625_s7 = inlined_call_operand.hbm [shape: f32[2,16,256], index: 7, kind: output, shape index: {}, may-alias: {0,7}]  }
   0x1   :  { %14 = vsyncpa [#allocation3 + $0x1], 0 }
   0x2   :  { %15 = vsyncpa [#allocation4], 0 }
   0x3   :  { %17 = vsyncpa [#allocation4 + $0x1], 0  ;;  %s1323_s24 = smov 0   ;;  %s1325_s25 = smov 0  }
   0x4   :  { %s1327_s26 = smov 0   ;;  %s1329_s27 = smov 0  }
   0x5   :  { %s1331_s28 = smov 0   ;;  %s1333_s29 = smov 0  }
   0x6 LB: > { %s1000_s30 = sadd.s32 4294967295, %s1273_s29   ;;  %s1001_s8 = sadd.s32 4294967294, %s1273_s29   ;;  %s1273_s29 = sphi %s1333_s29, %s23_s29   ;;  %s1269_s28 = sphi %s1331_s28, %s1640_s28   ;;  %s1265_s27 = sphi %s1329_s27, %s1639_s27   ;;  %s1261_s26 = sphi %s1327_s26, %s1638_s26   ;;  %s1257_s25 = sphi %s1325_s25, %s1637_s25   ;;  %s1253_s24 = sphi %s1323_s24, %s1636_s24  }
   0x7   : > { %s35_s9 = sadd.s32 1, %s1269_s28  ;;  %s44_s10 = sadd.s32 1, %s1261_s26 }
   0x8   : > { %p37_p0 = scmp.ge.s32.totalorder %s35_s9, 2  ;;  %p51_p1 = scmp.ne.s32.totalorder %s1261_s26, %s1257_s25 }
   0x9   : > { %p52_p2 = scmp.eq.s32.totalorder %s1273_s29, 0  ;;  %p57_p3 = scmp.ne.s32.totalorder %s1257_s25, %s1253_s24 }
   0xa   : > { %s1642_s9 = smov (%p37_p0, %s35_s9), 0  ;;  %p58_p5 = scmp.eq.s32.totalorder %s1000_s30, 0 }
   0xb   : > { %p1364_p4 = por %p52_p2, %p51_p1  ;;  %s39_s12 = ssub.s32 %s1269_s28, %s1642_s9 }
   0xc   : > { %p209_p6 = scmp.eq.s32.totalorder %s1000_s30, 1  ;;  %p42_p7 = scmp.eq.s32.totalorder %s39_s12, 0 }
   0xd   : > { %p1370_p8 = por %p58_p5, %p57_p3  ;;  %p215_p10 = scmp.eq.s32.totalorder %s1001_s8, 1 }
   0xe   : > { %p1374_p9 = por %p209_p6, %p51_p1  ;;  %p1083_p13 = scmp.lt.s32.totalorder %s1273_s29, 2 }
   0xf   : > { %s1379_s15 = scalar_select %p42_p7, %s1261_s26, %s44_s10  }
  0x10   : > { %s1629_s14 = scalar_select %p1374_p9, 1, 0 }
  0x11   : > { %p1381_p11 = por %p215_p10, %p57_p3  ;;  %s253_s17 = sand.u32 1, %s1261_s26  }
  0x12   : > { %s1004_s18 = sshll.u32 %s253_s17, 5  ;;  %s1033_s19 = sshll.u32 %s1269_s28, 9 }
  0x13   : > { %s1630_s16 = scalar_select %p1381_p11, 1, 0 }
  0x14   : > { %s1392_s22 = scalar_lea.hbm %s1618_s0, %s1033_s19  ;;  %s257_s23 = scalar_lea.vmem [#allocation2], %s1004_s18 }
  0x15   : > { %s266_s30 = sshll.u32 %s257_s23, 4  ;;  %p1398_p0 = pnand %p1083_p13, %p1364_p4  ;;  %s1394_s30 = int_to_ptr.vmem [resolvable:$true] %s266_s30 }
  0x16   : > { %s1403_s10 = scalar_lea.sflag [#allocation3], %s253_s17  ;;  %s1161_s12 = scalar_lea.hbm %s1392_s22, 512 }
  0x17   : > { %p1162_p2 = scmp.ne.s32.totalorder %s1392_s22, %s1161_s12  ;;  %p1163_p3 = pneg %p1398_p0 }
  0x18   : > { %s1166_s11 = scalar_lea.hbm %s1618_s0, 1024  ;;  %p1167_p4 = scmp.lt.u32.totalorder %s1392_s22, %s1618_s0 }
  0x19   : > { %p1164_p5 = pnand %p1163_p3, %p1162_p2  ;;  %p1168_p7 = scmp.lt.u32.totalorder %s1166_s11, %s1161_s12 }
  0x1a   : > { %p1170_p13 = scmp.lt.u32.totalorder %s1161_s12, %s1392_s22 }
  0x1b   : > { %p1165_p6 = pneg %p1164_p5  ;;  %p1169_p10 = por %p1168_p7, %p1167_p4 }
  0x1d   : > { %p1171_p12 = por %p1170_p13, %p1169_p10 }
  0x1f   : > { %p1172_p1 = pnand %p1171_p12, %p1165_p6 }
  0x21   : > { %1175 = shalt.err (!%p1172_p1)
}
  0x22   : > { %s1176_s17 = scalar_lea.vmem %s1394_s30, 512  ;;  %s1275_s23 = smov [#allocation2]  }
  0x23   : > { %p1177_p2 = scmp.ne.s32.totalorder %s1394_s30, %s1176_s17  ;;  %s1181_s18 = sshll.u32 %s1275_s23, 4  ;;  %s1182_s18 = int_to_ptr.vmem [resolvable:$false] %s1181_s18 }
  0x24   : > { %s1183_s19 = scalar_lea.vmem %s1182_s18, 1024  ;;  %p1184_p9 = scmp.lt.s32.totalorder %s1394_s30, %s1182_s18 }
  0x25   : > { %p1179_p5 = pnand %p1177_p2, %p1163_p3  ;;  %p1185_p4 = scmp.lt.s32.totalorder %s1183_s19, %s1176_s17 }
  0x27   : > { %p1180_p11 = pneg %p1179_p5  ;;  %p1186_p7 = por %p1185_p4, %p1184_p9 }
  0x29   : > { %p1187_p10 = pnand %p1186_p7, %p1180_p11 }
  0x2b   : > { %1190 = shalt.err (!%p1187_p10)
}
  0x2c   : > { %s1276_s12 = smov 256   ;;  %s1277_s11 = smov 16  }
  0x2d   : > { %1078 = dma.hbm_to_vmem [thread:$0]  (!%p1398_p0), %s1392_s22, 512, %s1394_s30, %s1403_s10, %s1276_s12, %s1276_s12, %s1277_s11  }
  0x2e   : > { %p274_p12 = scmp.lt.s32.totalorder %s1273_s29, 3  ;;  %p1632_p1 = scmp.ge.s32.totalorder %s1273_s29, 1 }
  0x30   : > { %p275_p3 = pnand %p1632_p1, %p274_p12 }
  0x31   : > { %s1435_s20 = sand.u32 (!%p275_p3), 1, %s1257_s25  }
  0x32   : > { %278 = sbr.rel (%p275_p3) target bundleno = 1056 (0x420), region = 48  ;;  %s1008_s21 = sshll.u32 (!%p275_p3), %s1435_s20, 5 }
  0x33   : > { %s281_s17 = scalar_lea.sflag (!%p275_p3), [#allocation3], %s1435_s20  ;;  %s284_s23 = scalar_lea.vmem (!%p275_p3), [#allocation2], %s1008_s21 }
  0x39   : > { %1244 = dma.done.wait (%p1370_p8), %s281_s17, 512  }
  0x3a   : > { %1246 = vsyncadd (%p1370_p8), %s281_s17, 4294966784  ;;  %v1278_v0 = vmov 0.0   ;;  %v1279_v1 = vmov 0   ;;  %v1447_v2 = vld [vmem:[%s284_s23 + $0x8] sm:$0xff]  ;;  %v1449_v3 = vld [vmem:[%s284_s23 + $0x18] sm:$0xff]  ;;  %vm327_vm0 = vcmask 130048  }
  0x3b   : > { %410 = vmatprep.mubr.f32.mxu1 %v1278_v0  ;;  %1139 = vset.pattern.permute.xlu0 %v1279_v1  ;;  %v1451_v4 = vld [vmem:[%s284_s23] sm:$0xff]  ;;  %v1035_v5 = vpack.c.bf16 %v1449_v3, %v1447_v2  ;;  %v1455_v6 = vld [vmem:[%s284_s23 + $0x10] sm:$0xff]  ;;  %v448_v10 = vld [vmem:[%s1620_s2 + $0x8] sm:$0xff]  ;;  %vm805_vm1 = vcmask 261120   ;;  %s314_s13 = scalar_lea.vmem [#allocation5], %s1008_s21  ;;  %s1034_s30 = sshll.u32 %s1265_s27, 9 }
  0x3c   : > { %555 = vmatprep.mubr.f32.mxu0 %v1278_v0  ;;  %1140 = vset.pattern.permute.xlu1 %v1279_v1  ;;  %v1037_v7 = vpack.c.bf16 %v1455_v6, %v1451_v4  ;;  %v447_v8 = vld [vmem:[%s1620_s2] sm:$0xff]  ;;  %v322_v11 = vld [vmem:[%s1619_s1 + $0x8] sm:$0xff]  ;;  %v469_v32 = vld [vmem:[%s1621_s3 + $0x10] sm:$0xff]  ;;  %s913_s22 = sshll.u32 %s314_s13, 4  ;;  %s1568_s21 = scalar_lea.hbm %s1625_s7, %s1034_s30  ;;  %s1562_s22 = int_to_ptr.vmem [resolvable:$true] %s913_s22 }
  0x3d   : > { %1036 = vmatprep.subr.bf16.mxu1 %v1035_v5  ;;  %451 = vperm.xlu0 %1139, %v447_v8   ;;  %v321_v9 = vld [vmem:[%s1619_s1] sm:$0xff]  ;;  %v593_v13 = vld [vmem:[%s1622_s4 + $0x8] sm:$0xff]  ;;  %v470_v33 = vld [vmem:[%s1621_s3 + $0x18] sm:$0xff]  ;;  %s898_s27 = scalar_lea.sflag [#allocation4], %s1435_s20  ;;  %s1191_s18 = scalar_lea.vmem %s1562_s22, 512 }
  0x3e   : > { %1038 = vmatpush1.bf16.msra.mxu1 %v1037_v7  ;;  %v592_v12 = vld [vmem:[%s1622_s4] sm:$0xff]  ;;  %v468_v31 = vld [vmem:[%s1621_s3 + $0x8] sm:$0xff]  ;;  %v323_v36 = vld [vmem:[%s1619_s1 + $0x10] sm:$0xff]  ;;  %p1192_p8 = scmp.ne.s32.totalorder %s1562_s22, %s1191_s18  ;;  %p1633_p9 = scmp.ne.s32.totalorder %s1629_s14, 0 }
  0x3f   : > { %596 = vperm.xlu1 %1140, %v592_v12   ;;  %v467_v30 = vld [vmem:[%s1621_s3] sm:$0xff]  ;;  %v472_v35 = vld [vmem:[%s1621_s3 + $0x28] sm:$0xff]  ;;  %v324_v37 = vld [vmem:[%s1619_s1 + $0x18] sm:$0xff]  ;;  %s1280_s19 = smov [#allocation5]  }
  0x40   : > { %v471_v34 = vld [vmem:[%s1621_s3 + $0x20] sm:$0xff]  ;;  %v326_v39 = vld [vmem:[%s1619_s1 + $0x28] sm:$0xff]  ;;  %v622_v58 = vld [vmem:[%s1623_s5 + $0x10] sm:$0xff]  ;;  %p1193_p11 = pnand %p1192_p8, %p1633_p9  ;;  %s1195_s12 = sshll.u32 %s1280_s19, 4  ;;  %s1196_s12 = int_to_ptr.vmem [resolvable:$false] %s1195_s12 }
  0x41   : > { %1010 = vmatmul.mubr.msk.f32.vlgmr.msra.gmra.mrb[0].mxu1 %vm327_vm0, %v321_v9  ;;  %456 = vperm.xlu0 %1139, %v448_v10   ;;  %v325_v38 = vld [vmem:[%s1619_s1 + $0x20] sm:$0xff]  ;;  %v621_v57 = vld [vmem:[%s1623_s5 + $0x8] sm:$0xff]  ;;  %v623_v59 = vld [vmem:[%s1623_s5 + $0x18] sm:$0xff]  ;;  %s1197_s11 = scalar_lea.vmem %s1196_s12, 1024  ;;  %p1198_p6 = scmp.lt.s32.totalorder %s1562_s22, %s1196_s12 }
  0x42   : > { %416 = vmatprep.mubr.f32.mxu1 %v1278_v0  ;;  %v620_v56 = vld [vmem:[%s1623_s5] sm:$0xff]  ;;  %p1194_p0 = pneg %p1193_p11  ;;  %p1199_p13 = scmp.lt.s32.totalorder %s1197_s11, %s1191_s18 }
  0x43   : > { %601 = vperm.xlu1 %1140, %v593_v13  }
  0x44   : > { %p1200_p2 = por %p1199_p13, %p1198_p6 }
  0x45   : > { %1011 = vmatmul.mubr.msk.f32.gmra.mrb[2].mxu1 %vm327_vm0, %v322_v11 }
  0x46   : > { %422 = vmatprep.mubr.f32.mxu1 %v1278_v0  ;;  %p1201_p5 = pnand %p1200_p2, %p1194_p0 }
  0x49   : > { %1012 = vmatmul.mubr.msk.f32.gmra.mrb[4].mxu1 %vm327_vm0, %v323_v36 }
  0x4a   : > { %428 = vmatprep.mubr.f32.mxu1 %v1278_v0 }
  0x4d   : > { %1013 = vmatmul.mubr.msk.f32.gmra.mrb[6].mxu1 %vm327_vm0, %v324_v37 }
  0x4e   : > { %434 = vmatprep.mubr.f32.mxu1 %v1278_v0 }
  0x51   : > { %1014 = vmatmul.mubr.msk.f32.gmra.mrb[8].mxu1 %vm327_vm0, %v325_v38 }
  0x52   : > { %440 = vmatprep.mubr.f32.mxu1 %v1278_v0 }
  0x55   : > { %1015 = vmatmul.mubr.msk.f32.gmra.mrb[10].mxu1 %vm327_vm0, %v326_v39 }
  0x56   : > { %876 = vmatprep.mubr.f32.mxu1 %v1278_v0 }
  0xbc   : > { %v452_v14 = vpop.permute.xlu0 %451 }
  0xbe   : > { %v597_v40 = vpop.permute.xlu1 %596 }
  0xc0   : > { %v457_v18 = vpop.permute.xlu0 %456 }
  0xc2   : > { %v602_v44 = vpop.permute.xlu1 %601 }
 0x114   : > { %v412_v15 = vpop.f32.mrb[0].mxu1 }
 0x115   : > { %v414_v16 = vpop.f32.mrb[1].mxu1  ;;  %v459_v17 = vadd.f32 %v452_v14, %v412_v15 }
 0x116   : > { %v460_v19 = vadd.f32 %v452_v14, %v414_v16 }
 0x117   : > { %v463_v24 = vmax.f32 %v459_v17, 0.0 }
 0x118   : > { %v418_v20 = vpop.f32.mrb[2].mxu1  ;;  %v464_v26 = vmax.f32 %v460_v19, 0.0 }
 0x119   : > { %v461_v21 = vadd.f32 %v457_v18, %v418_v20  ;;  %v420_v22 = vpop.f32.mrb[3].mxu1 }
 0x11a   : > { %v462_v23 = vadd.f32 %v457_v18, %v420_v22 }
 0x11b   : > { %v465_v25 = vmax.f32 %v461_v21, 0.0 }
 0x11c   : > { %v466_v27 = vmax.f32 %v462_v23, 0.0  ;;  %v424_v60 = vpop.f32.mrb[4].mxu1 }
 0x11d   : > { %v1041_v28 = vpack.c.bf16 %v465_v25, %v463_v24  ;;  %v426_v61 = vpop.f32.mrb[5].mxu1 }
 0x11e   : > { %v1039_v29 = vpack.c.bf16 %v466_v27, %v464_v26 }
 0x120   : > { %1040 = vmatprep.subr.bf16.mxu0 %v1039_v29  ;;  %v430_v62 = vpop.f32.mrb[6].mxu1 }
 0x121   : > { %1042 = vmatpush1.bf16.msra.mxu0 %v1041_v28  ;;  %v432_v63 = vpop.f32.mrb[7].mxu1 }
 0x124   : > { %1016 = vmatmul.mubr.msk.f32.vlgmr.msra.gmra.mrb[0].mxu0 %vm327_vm0, %v467_v30  ;;  %v436_v1 = vpop.f32.mrb[8].mxu1 }
 0x125   : > { %561 = vmatprep.mubr.f32.mxu0 %v1278_v0  ;;  %v438_v5 = vpop.f32.mrb[9].mxu1 }
 0x128   : > { %1017 = vmatmul.mubr.msk.f32.gmra.mrb[2].mxu0 %vm327_vm0, %v468_v31  ;;  %v442_v7 = vpop.f32.mrb[10].mxu1 }
 0x129   : > { %567 = vmatprep.mubr.f32.mxu0 %v1278_v0  ;;  %v444_v8 = vpop.f32.mrb[11].mxu1 }
 0x12c   : > { %1018 = vmatmul.mubr.msk.f32.gmra.mrb[4].mxu0 %vm327_vm0, %v469_v32 }
 0x12d   : > { %573 = vmatprep.mubr.f32.mxu0 %v1278_v0 }
 0x130   : > { %1019 = vmatmul.mubr.msk.f32.gmra.mrb[6].mxu0 %vm327_vm0, %v470_v33 }
 0x131   : > { %579 = vmatprep.mubr.f32.mxu0 %v1278_v0 }
 0x134   : > { %1020 = vmatmul.mubr.msk.f32.gmra.mrb[8].mxu0 %vm327_vm0, %v471_v34 }
 0x135   : > { %585 = vmatprep.mubr.f32.mxu0 %v1278_v0 }
 0x138   : > { %1021 = vmatmul.mubr.msk.f32.gmra.mrb[10].mxu0 %vm327_vm0, %v472_v35 }
 0x139   : > { %700 = vmatprep.mubr.f32.mxu0 %v1278_v0 }
 0x1f7   : > { %v557_v41 = vpop.f32.mrb[0].mxu0 }
 0x1f8   : > { %v559_v42 = vpop.f32.mrb[1].mxu0  ;;  %v604_v43 = vadd.f32 %v597_v40, %v557_v41 }
 0x1f9   : > { %v605_v45 = vadd.f32 %v597_v40, %v559_v42 }
 0x1fa   : > { %v608_v50 = vmax.f32 %v604_v43, 0.0 }
 0x1fb   : > { %v563_v46 = vpop.f32.mrb[2].mxu0  ;;  %v609_v52 = vmax.f32 %v605_v45, 0.0 }
 0x1fc   : > { %v606_v47 = vadd.f32 %v602_v44, %v563_v46  ;;  %v565_v48 = vpop.f32.mrb[3].mxu0 }
 0x1fd   : > { %v607_v49 = vadd.f32 %v602_v44, %v565_v48 }
 0x1fe   : > { %v610_v51 = vmax.f32 %v606_v47, 0.0 }
 0x1ff   : > { %v611_v53 = vmax.f32 %v607_v49, 0.0 }
 0x200   : > { %v1045_v54 = vpack.c.bf16 %v610_v51, %v608_v50 }
 0x201   : > { %v1043_v55 = vpack.c.bf16 %v611_v53, %v609_v52 }
 0x203   : > { %1044 = vmatprep.subr.bf16.mxu0 %v1043_v55 }
 0x204   : > { %1046 = vmatpush1.bf16.msra.mxu0 %v1045_v54 }
 0x207   : > { %1022 = vmatmul.mubr.msk.f32.vlgmr.msra.gmra.mrb[4].mxu0 %vm327_vm0, %v620_v56 }
 0x208   : > { %706 = vmatprep.mubr.f32.mxu0 %v1278_v0 }
 0x20b   : > { %1023 = vmatmul.mubr.msk.f32.gmra.mrb[6].mxu0 %vm327_vm0, %v621_v57 }
 0x20c   : > { %712 = vmatprep.mubr.f32.mxu0 %v1278_v0 }
 0x20f   : > { %1024 = vmatmul.mubr.msk.f32.gmra.mrb[8].mxu0 %vm327_vm0, %v622_v58 }
 0x210   : > { %718 = vmatprep.mubr.f32.mxu0 %v1278_v0 }
 0x213   : > { %1025 = vmatmul.mubr.msk.f32.gmra.mrb[10].mxu0 %vm327_vm0, %v623_v59 }
 0x2da   : > { %v702_v9 = vpop.f32.mrb[4].mxu0 }
 0x2db   : > { %v1055_v10 = vadd.f32 %v702_v9, %v424_v60  ;;  %v704_v11 = vpop.f32.mrb[5].mxu0 }
 0x2dc   : > { %v1056_v12 = vadd.f32 %v704_v11, %v426_v61 }
 0x2de   : > { %v708_v13 = vpop.f32.mrb[6].mxu0 }
 0x2df   : > { %v1057_v14 = vadd.f32 %v708_v13, %v430_v62  ;;  %v710_v15 = vpop.f32.mrb[7].mxu0 }
 0x2e0   : > { %v1058_v16 = vadd.f32 %v710_v15, %v432_v63 }
 0x2e2   : > { %v714_v17 = vpop.f32.mrb[8].mxu0 }
 0x2e3   : > { %v1059_v18 = vadd.f32 %v714_v17, %v436_v1  ;;  %v716_v19 = vpop.f32.mrb[9].mxu0 }
 0x2e4   : > { %v1060_v20 = vadd.f32 %v716_v19, %v438_v5 }
 0x2e5   : > { %v733_v21 = vmax.f32 %v1055_v10, %v1059_v18 }
 0x2e6   : > { %v742_v22 = vmax.f32 %v1056_v12, %v1060_v20  ;;  %v720_v23 = vpop.f32.mrb[10].mxu0 }
 0x2e7   : > { %v1061_v24 = vadd.f32 %v720_v23, %v442_v7  ;;  %v722_v25 = vpop.f32.mrb[11].mxu0 }
 0x2e8   : > { %v1062_v26 = vadd.f32 %v722_v25, %v444_v8 }
 0x2e9   : > { %v734_v27 = vmax.f32 %v1057_v14, %v1061_v24 }
 0x2ea   : > { %v743_v28 = vmax.f32 %v1058_v16, %v1062_v26 }
 0x2eb   : > { %v735_v29 = vmax.f32 %v733_v21, %v734_v27 }
 0x2ec   : > { %v744_v30 = vmax.f32 %v742_v22, %v743_v28 }
 0x2ed   : > { %v736_v31 = vrot.slane %v735_v29, 4 }
 0x2ee   : > { %v745_v32 = vrot.slane %v744_v30, 4 }
 0x2ef   : > { %v737_v33 = vmax.f32 %v735_v29, %v736_v31 }
 0x2f0   : > { %v746_v34 = vmax.f32 %v744_v30, %v745_v32 }
 0x2f1   : > { %v738_v35 = vrot.slane %v737_v33, 2 }
 0x2f2   : > { %v747_v36 = vrot.slane %v746_v34, 2 }
 0x2f3   : > { %v739_v37 = vmax.f32 %v737_v33, %v738_v35 }
 0x2f4   : > { %v748_v38 = vmax.f32 %v746_v34, %v747_v36 }
 0x2f5   : > { %v740_v39 = vrot.slane %v739_v37, 1 }
 0x2f6   : > { %v749_v40 = vrot.slane %v748_v38, 1 }
 0x2f7   : > { %v741_v41 = vmax.f32 %v739_v37, %v740_v39 }
 0x2f8   : > { %v750_v42 = vmax.f32 %v748_v38, %v749_v40  ;;  %v803_v40 = vld [vmem:[%s1624_s6] sm:$0xff] }
 0x2f9   : > { %v751_v43 = vsub.f32 %v1055_v10, %v741_v41  ;;  %v753_v44 = vsub.f32 %v1057_v14, %v741_v41  ;;  %v755_v45 = vsub.f32 %v1059_v18, %v741_v41  ;;  %v757_v46 = vsub.f32 %v1061_v24, %v741_v41  ;;  %v804_v41 = vld [vmem:[%s1624_s6 + $0x8] sm:$0xff] }
 0x2fa   : > { %v752_v47 = vsub.f32 %v1056_v12, %v750_v42  ;;  %v754_v48 = vsub.f32 %v1058_v16, %v750_v42  ;;  %v756_v49 = vsub.f32 %v1060_v20, %v750_v42  ;;  %v758_v50 = vsub.f32 %v1062_v26, %v750_v42 }
 0x2fb   : > { %v759_v51 = vmul.f32 1.442695, %v751_v43  ;;  %v763_v52 = vmul.f32 1.442695, %v753_v44  ;;  %v767_v53 = vmul.f32 1.442695, %v755_v45 }
 0x2fc   : > { %v771_v54 = vmul.f32 1.442695, %v757_v46  ;;  %v761_v55 = vmul.f32 1.442695, %v752_v47  ;;  %v765_v56 = vmul.f32 1.442695, %v754_v48 }
 0x2fd   : > { %1141 = vpow2.f32 %v759_v51  ;;  %v769_v57 = vmul.f32 1.442695, %v756_v49  ;;  %v773_v58 = vmul.f32 1.442695, %v758_v50 }
 0x2fe   : > { %1143 = vpow2.f32 %v763_v52 }
 0x2ff   : > { %1145 = vpow2.f32 %v767_v53 }
 0x300   : > { %1147 = vpow2.f32 %v771_v54 }
 0x301   : > { %1149 = vpow2.f32 %v761_v55 }
 0x302   : > { %1151 = vpow2.f32 %v765_v56 }
 0x303   : > { %1153 = vpow2.f32 %v769_v57 }
 0x304   : > { %1155 = vpow2.f32 %v773_v58 }
 0x307   : > { %v1142_v59 = vpop.eup %1141 }
 0x308   : > { %v1144_v60 = vpop.eup %1143 }
 0x309   : > { %v1146_v61 = vpop.eup %1145  ;;  %v775_v62 = vadd.f32 %v1144_v60, %v1142_v59 }
 0x30a   : > { %v1148_v63 = vpop.eup %1147 }
 0x30b   : > { %v1150_v1 = vpop.eup %1149  ;;  %v776_v5 = vadd.f32 %v1146_v61, %v775_v62 }
 0x30c   : > { %v1152_v7 = vpop.eup %1151 }
 0x30d   : > { %v777_v8 = vadd.f32 %v1148_v63, %v776_v5  ;;  %v784_v9 = vadd.f32 %v1152_v7, %v1150_v1  ;;  %v1154_v10 = vpop.eup %1153 }
 0x30e   : > { %v1156_v13 = vpop.eup %1155 }
 0x30f   : > { %v778_v11 = vrot.slane %v777_v8, 4  ;;  %v785_v12 = vadd.f32 %v1154_v10, %v784_v9 }
 0x311   : > { %v779_v14 = vadd.f32 %v778_v11, %v777_v8  ;;  %v786_v15 = vadd.f32 %v1156_v13, %v785_v12 }
 0x313   : > { %v780_v16 = vrot.slane %v779_v14, 2  ;;  %v787_v17 = vrot.slane %v786_v15, 4 }
 0x315   : > { %v781_v18 = vadd.f32 %v780_v16, %v779_v14  ;;  %v788_v19 = vadd.f32 %v787_v17, %v786_v15 }
 0x317   : > { %v782_v20 = vrot.slane %v781_v18, 1  ;;  %v789_v21 = vrot.slane %v788_v19, 2 }
 0x319   : > { %v783_v22 = vadd.f32 %v782_v20, %v781_v18  ;;  %v790_v23 = vadd.f32 %v789_v21, %v788_v19 }
 0x31b   : > { %1157 = vrcp.f32 %v783_v22  ;;  %v791_v24 = vrot.slane %v790_v23, 1 }
 0x31d   : > { %v792_v25 = vadd.f32 %v791_v24, %v790_v23 }
 0x31f   : > { %1159 = vrcp.f32 %v792_v25 }
 0x325   : > { %v1158_v26 = vpop.eup %1157 }
 0x326   : > { %v795_v27 = vmul.f32 %v1158_v26, %v1142_v59  ;;  %v797_v28 = vmul.f32 %v1158_v26, %v1144_v60  ;;  %v799_v29 = vmul.f32 %v1158_v26, %v1146_v61  ;;  %v801_v30 = vmul.f32 %v1158_v26, %v1148_v63 }
 0x328   : > { %v1049_v31 = vpack.c.bf16 %v797_v28, %v795_v27  ;;  %v1053_v32 = vpack.c.bf16 %v801_v30, %v799_v29 }
 0x329   : > { %v1160_v33 = vpop.eup %1159 }
 0x32a   : > { %v796_v34 = vmul.f32 %v1160_v33, %v1150_v1  ;;  %v798_v35 = vmul.f32 %v1160_v33, %v1152_v7  ;;  %v800_v36 = vmul.f32 %v1160_v33, %v1154_v10  ;;  %v802_v37 = vmul.f32 %v1160_v33, %v1156_v13 }
 0x32c   : > { %v1047_v38 = vpack.c.bf16 %v798_v35, %v796_v34  ;;  %v1051_v39 = vpack.c.bf16 %v802_v37, %v800_v36 }
 0x32e   : > { %1048 = vmatprep.subr.bf16.mxu1 %v1047_v38 }
 0x32f   : > { %1050 = vmatpush1.bf16.msra.mxu1 %v1049_v31 }
 0x330   : > { %1052 = vmatprep.subr.bf16.mxu1 %v1051_v39 }
 0x333   : > { %1054 = vmatpush1.bf16.msra.mxu1 %v1053_v32 }
 0x336   : > { %1026 = vmatmul.mubr.msk.f32.vlgmr.msra.gmra.mrb[12].mxu1 %vm805_vm1, %v803_v40 }
 0x337   : > { %882 = vmatprep.mubr.f32.mxu1 %v1278_v0 }
 0x33a   : > { %1027 = vmatmul.mubr.msk.f32.gmra.mrb[14].mxu1 %vm805_vm1, %v804_v41 }
 0x409   : > { %v878_v42 = vpop.f32.mrb[12].mxu1 }
 0x40a   : > { %v889_v43 = vadd.f32 %v878_v42, %v1451_v4  ;;  %v880_v44 = vpop.f32.mrb[13].mxu1 }
 0x40b   : > { %v890_v45 = vadd.f32 %v880_v44, %v1447_v2 }
 0x40c   : > { %893 = vst [vmem:[%s314_s13] sm:$0xff] %v889_v43 }
 0x40d   : > { %894 = vst [vmem:[%s314_s13 + $0x8] sm:$0xff] %v890_v45  ;;  %v884_v0 = vpop.f32.mrb[14].mxu1 }
 0x40e   : > { %v891_v46 = vadd.f32 %v884_v0, %v1455_v6  ;;  %v886_v4 = vpop.f32.mrb[15].mxu1 }
 0x40f   : > { %v892_v47 = vadd.f32 %v886_v4, %v1449_v3 }
 0x410   : > { %895 = vst [vmem:[%s314_s13 + $0x10] sm:$0xff] %v891_v46 }
 0x411   : > { %896 = vst [vmem:[%s314_s13 + $0x18] sm:$0xff] %v892_v47 }
 0x412   : > { %1204 = shalt.err (!%p1201_p5)
}
 0x413   : > { %s1205_s17 = scalar_lea.hbm %s1568_s21, 512  ;;  %s1209_s30 = scalar_lea.hbm %s1625_s7, 1024 }
 0x414   : > { %p1206_p4 = scmp.ne.s32.totalorder %s1568_s21, %s1205_s17  ;;  %p1210_p12 = scmp.lt.u32.totalorder %s1568_s21, %s1625_s7 }
 0x415   : > { %p1211_p1 = scmp.lt.u32.totalorder %s1209_s30, %s1205_s17  ;;  %p1213_p8 = scmp.lt.u32.totalorder %s1205_s17, %s1568_s21 }
 0x416   : > { %p1207_p7 = pnand %p1206_p4, %p1633_p9 }
 0x417   : > { %p1212_p3 = por %p1211_p1, %p1210_p12 }
 0x418   : > { %p1208_p10 = pneg %p1207_p7 }
 0x419   : > { %p1214_p11 = por %p1213_p8, %p1212_p3 }
 0x41b   : > { %p1215_p0 = pnand %p1214_p11, %p1208_p10 }
 0x41d   : > { %1218 = shalt.err (!%p1215_p0)
}
 0x41e   : > { %s1281_s18 = smov 256   ;;  %s1282_s19 = smov 16  }
 0x41f   : > { %1073 = dma.vmem_to_hbm [thread:$0]  (%p1633_p9), %s1562_s22, 512, %s1568_s21, %s898_s27, %s1281_s18, %s1281_s18, %s1282_s19  }
 0x420 PF: > { %s928_s12 = sand.u32 1, %s1253_s24   ;;  %p1634_p6 = scmp.ne.s32.totalorder %s1630_s16, 0 }
 0x421   : > { %p1635_p13 = scmp.ge.s32.totalorder %s1273_s29, 2  ;;  %s929_s11 = scalar_lea.sflag [#allocation4], %s928_s12 }
 0x423   : > { %p1080_p2 = pnand %p1635_p13, %p1634_p6 }
 0x425   : > { %1248 = dma.done.wait (!%p1080_p2), %s929_s11, 512  }
 0x426   : > { %1250 = vsyncadd (!%p1080_p2), %s929_s11, 4294966784  ;;  %s23_s29 = sadd.s32 1, %s1273_s29   ;;  %s1636_s24 = smov %s1257_s25 }
 0x427   : > { %p20_p5 = scmp.ge.s32.totalorder %s23_s29, 4   ;;  %s1637_s25 = smov %s1261_s26 }
 0x428   : > { %s1638_s26 = smov %s1379_s15  ;;  %s1639_s27 = smov %s1269_s28 }
 0x429   : > { %s1640_s28 = smov %s1642_s9  ;;  %22 = sbr.rel (!%p20_p5) target bundleno = 6 (0x6), region = 93 }
 0x430   :  { %934 = vsyncpa [#allocation3], 1 }
 0x431   :  { %936 = vsyncpa [#allocation3 + $0x1], 1 }
 0x432   :  { %937 = vsyncpa [#allocation4], 1 }
 0x433   :  { %939 = vsyncpa [#allocation4 + $0x1], 1 }

</bundles_post_ra>
